<compile_context>
chip_gen: v5e
topology: v5e:2x2
jax: 0.10.0
libtpu: 0.0.40
codegen_flags: <defaults>
</compile_context>

<pallas_src>
import numpy as np
import jax
import jax.numpy as jnp
from jax.experimental import pallas as pl
from jax.experimental.pallas import tpu as pltpu


# ----------------------------- Pallas kernel ---------------------------------

def _make_ner_kernel(lq_tile: int, hd2p: int, compute_dtype):
    """Kernel over grid (tag, batch_block, query_tile).

    refs:
      h_ref   : (Bblk, Lpad, H)     hidden states (compute_dtype)
      wq_ref  : (H, HDp)            per-tag q weights (scale/heads pre-folded)
      bq_ref  : (1, HDp)            per-tag q bias   (f32, scale/heads folded)
      wk_ref  : (H, HDp)            per-tag k weights
      bk_ref  : (1, HDp)            per-tag k bias   (f32)
      cos_ref : (Lpad, HDp)         [cos | cos]   (f32, zero beyond L)
      sin_ref : (Lpad, HDp)         [-sin | sin]  (f32, zero beyond L)
      o_ref   : (Bblk, Lq, Lpad)    score tile
      krot_ref: (Bblk, Lpad, HDp)   rotated-K cache (compute_dtype scratch),
                                    reused across the query-tile grid axis
    """

    def rotate(x, cos, sin):
        # x: (Bblk, rows, HDp) f32. Rotate-half via an aligned XLU lane roll;
        # the sign is folded into the sin table ([-sin | sin]).
        xr = pltpu.roll(x, shift=hd2p, axis=2)
        return (x * cos + xr * sin).astype(compute_dtype)

    def kernel(h_ref, wq_ref, bq_ref, wk_ref, bk_ref, cos_ref, sin_ref,
               o_ref, krot_ref):
        bb, lpad, hdim = h_ref.shape
        hdp = wq_ref.shape[1]

        # ---- K projection + rotation: once per (tag, batch block), cached ----
        @pl.when(pl.program_id(2) == 0)
        def _():
            hk = h_ref[...].reshape(bb * lpad, hdim)
            k = jnp.dot(hk, wk_ref[...], preferred_element_type=jnp.float32)
            k = (k + bk_ref[...]).reshape(bb, lpad, hdp)
            krot_ref[...] = rotate(k, cos_ref[...][None], sin_ref[...][None])

        # ---- Q projection for this query tile ----
        q0 = pl.multiple_of(pl.program_id(2) * lq_tile, lq_tile)
        hq = h_ref[:, pl.ds(q0, lq_tile), :].reshape(bb * lq_tile, hdim)
        q = jnp.dot(hq, wq_ref[...], preferred_element_type=jnp.float32)
        q = (q + bq_ref[...]).reshape(bb, lq_tile, hdp)
        q_rot = rotate(q, cos_ref[pl.ds(q0, lq_tile), :][None],
                       sin_ref[pl.ds(q0, lq_tile), :][None])

        # scale and the mean over heads are pre-folded into wq/bq; one
        # full-width contraction (K = HDp) per tile, f32 accumulation.
        s = jnp.einsum('bqd,bkd->bqk', q_rot, krot_ref[...],
                       preferred_element_type=jnp.float32)
        o_ref[...] = s.astype(o_ref.dtype)

    return kernel


# ----------------------------- wrapper ----------------------------------------

def _round_up(x, m):
    return ((x + m - 1) // m) * m


def ner_score_pallas(hidden, wq, bq, wk, bk, pos_table, *, heads, tag_size, scale,
                     compute_dtype=jnp.bfloat16, out_dtype=jnp.float32,
                     out_layout="btll", b_block=None, lq_tile=None):
    """hidden: (B, L, H) f32.  wq/wk: (H*T, H) PyTorch Linear weights, bq/bk: (H*T,).

    Returns score == mean over heads of the scaled RoPE q.k^T:
      out_layout="btll" (default, recommended): (B, T, L, L)
      out_layout="bllt": (B, L, L, T)  matches PyTorch but costs an extra
                          lane-sparse pass over the largest tensor.

    Note: with the default compute_dtype=bfloat16 the scale/heads factor is
    folded into wq/bq *before* bf16 quantization of the weights, so scores
    match the f32 reference to ~1e-3 relative rather than bit-exactly.
    """
    B, L, H = hidden.shape
    T = tag_size
    D = H // heads
    assert heads * D == H and D % 2 == 0, "head dim must be even for RoPE"
    HD2 = heads * (D // 2)                      # width of one rotary half
    HD2p = _round_up(HD2, 128)                  # pad halves to full 128-lane blocks
    HDp = 2 * HD2p
    coeff = scale / heads                       # per-head scale + mean over heads

    L_pad = max(128, _round_up(L, 128))         # lane-dense, unmasked stores

    # --- host-side weight re-packing: per-tag, [even rotary dims | odd rotary
    #     dims], each half zero-padded to HD2p lanes (padded columns contribute
    #     exactly 0 to the score).
    def rearrange_w(W):
        Wt = W.T.reshape(H, T, heads, D // 2, 2)
        We = Wt[..., 0].reshape(H, T, HD2)
        Wo = Wt[..., 1].reshape(H, T, HD2)
        Wp = jnp.zeros((H, T, HDp), W.dtype)
        Wp = Wp.at[:, :, :HD2].set(We).at[:, :, HD2p:HD2p + HD2].set(Wo)
        return Wp.transpose(1, 0, 2)            # (T, H, HDp)

    def rearrange_b(b):
        bt = b.reshape(T, heads, D // 2, 2)
        be = bt[..., 0].reshape(T, HD2)
        bo = bt[..., 1].reshape(T, HD2)
        bp = jnp.zeros((T, 1, HDp), jnp.float32)
        return bp.at[:, 0, :HD2].set(be).at[:, 0, HD2p:HD2p + HD2].set(bo)

    # fold scale/heads into the q-side projection (exact: RoPE/score are linear in q)
    wq_r = (rearrange_w(wq) * coeff).astype(compute_dtype)
    wk_r = rearrange_w(wk).astype(compute_dtype)
    bq_r = (rearrange_b(bq) * coeff).astype(jnp.float32)
    bk_r = rearrange_b(bk).astype(jnp.float32)

    # rotary tables, full width: [cos | cos] and [-sin | sin]; rows beyond L
    # and padded columns are zero -> padded rows/columns score exactly 0.
    sin_t = jnp.tile(pos_table[:L, : D // 2], (1, heads))   # (L, HD2)
    cos_t = jnp.tile(pos_table[:L, D // 2:], (1, heads))
    cos_full = (jnp.zeros((L_pad, HDp), jnp.float32)
                .at[:L, :HD2].set(cos_t).at[:L, HD2p:HD2p + HD2].set(cos_t))
    sin_signed = (jnp.zeros((L_pad, HDp), jnp.float32)
                  .at[:L, :HD2].set(-sin_t).at[:L, HD2p:HD2p + HD2].set(sin_t))

    hidden_p = jnp.zeros((B, L_pad, H), compute_dtype).at[:, :L].set(
        hidden.astype(compute_dtype))

    # ---- generation-aware VMEM / tiling heuristics ----
    phys_vmem = 128 * 1024 * 1024
    try:
        phys_vmem = int(getattr(pltpu.get_tpu_info(), "vmem_capacity_bytes",
                                phys_vmem))
    except Exception:
        pass
    vmem_cap = min((phys_vmem * 9) // 10, 100 * 1024 * 1024)      # never > ~90% phys
    target_m = 1024 if phys_vmem >= 100 * 1024 * 1024 else 512    # Bblk*Lpad goal

    wbytes = jnp.dtype(compute_dtype).itemsize
    obytes = jnp.dtype(out_dtype).itemsize

    def vmem_estimate(bb, lq):
        return (2 * bb * L_pad * H * wbytes              # hidden (double-buffered)
                + 2 * 2 * (H * HDp * wbytes + HDp * 4)   # Wq/Wk + f32 biases
                + 2 * 2 * L_pad * HDp * 4                # cos / signed-sin tables
                + 2 * bb * lq * L_pad * obytes           # output block (double-buffered)
                + bb * L_pad * HDp * wbytes              # rotated-K cache (scratch)
                + 3 * bb * L_pad * HDp * 4               # K proj/rotation f32 temps
                + 3 * bb * lq * HDp * 4                  # Q proj/rotation f32 temps
                + bb * lq * L_pad * 4)                   # f32 score before the cast

    # batch block: fill the MXU M dim while dividing B.
    # TODO(synk): prime/awkward B silently falls back to b_block=1 (perf cliff).
    if b_block is None:
        want = max(1, target_m // L_pad)
        b_block = max(d for d in range(1, min(B, want) + 1) if B % d == 0)
    assert B % b_block == 0

    # query tile: largest 128-multiple divisor of L_pad that keeps the estimate
    # under the per-generation VMEM cap (mainly shrinks on v7x at long L).
    if lq_tile is None:
        cands = [c for c in range(L_pad, 127, -128) if L_pad % c == 0]
        ci = 0
        lq_tile = cands[ci]
        while vmem_estimate(b_block, lq_tile) > vmem_cap:
            if ci + 1 < len(cands):
                ci += 1
                lq_tile = cands[ci]
            elif b_block > 1:
                b_block = max(d for d in range(1, b_block) if B % d == 0)
            else:
                break
    assert L_pad % lq_tile == 0 and lq_tile % 128 == 0
    n_lq = L_pad // lq_tile

    vmem_limit = int(min(max(vmem_estimate(b_block, lq_tile) * 5 // 4,
                             32 * 1024 * 1024), vmem_cap))

    kernel = _make_ner_kernel(lq_tile, HD2p, compute_dtype)

    out_pad = pl.pallas_call(
        kernel,
        out_shape=jax.ShapeDtypeStruct((B, T, L_pad, L_pad), out_dtype),
        # tag OUTER -> per-tag weights stay resident across the batch sweep;
        # query-tile INNER -> the rotated-K cache is reused across q tiles.
        grid=(T, B // b_block, n_lq),
        in_specs=[
            pl.BlockSpec((b_block, L_pad, H),     lambda t, b, l: (b, 0, 0)),   # hidden
            pl.BlockSpec((pl.Squeezed(), H, HDp), lambda t, b, l: (t, 0, 0)),   # Wq
            pl.BlockSpec((pl.Squeezed(), 1, HDp), lambda t, b, l: (t, 0, 0)),   # bq
            pl.BlockSpec((pl.Squeezed(), H, HDp), lambda t, b, l: (t, 0, 0)),   # Wk
            pl.BlockSpec((pl.Squeezed(), 1, HDp), lambda t, b, l: (t, 0, 0)),   # bk
            pl.BlockSpec((L_pad, HDp),            lambda t, b, l: (0, 0)),      # cos
            pl.BlockSpec((L_pad, HDp),            lambda t, b, l: (0, 0)),      # -sin|sin
        ],
        out_specs=pl.BlockSpec((b_block, pl.Squeezed(), lq_tile, L_pad),
                               lambda t, b, l: (b, t, l, 0)),
        scratch_shapes=[pltpu.VMEM((b_block, L_pad, HDp), compute_dtype)],
        compiler_params=pltpu.CompilerParams(
            # batch axis 'arbitrary' so a megacore split lands on the tag axis
            # (keeps Wq/Wk HBM traffic at T fetches per chip); the query-tile
            # axis carries the K cache -> 'arbitrary'.
            dimension_semantics=("parallel", "arbitrary", "arbitrary"),
            vmem_limit_bytes=vmem_limit),
    )(hidden_p, wq_r, bq_r, wk_r, bk_r, cos_full, sin_signed)

    score_btll = out_pad if L_pad == L else out_pad[:, :, :L, :L]
    if out_layout == "bllt":   # PyTorch layout; discouraged (extra lane-sparse pass)
        return jnp.transpose(score_btll, (0, 2, 3, 1))
    return score_btll


# ----------------------------- reference & setup ------------------------------

def make_sinusoidal_table(num_positions, dim):
    position_enc = np.array(
        [[pos / np.power(10000, 2 * (j // 2) / dim) for j in range(dim)]
         for pos in range(num_positions)], dtype=np.float64)
    sentinel = dim // 2 if dim % 2 == 0 else dim // 2 + 1
    out = np.zeros((num_positions, dim), dtype=np.float32)
    out[:, 0:sentinel] = np.sin(position_enc[:, 0::2]).astype(np.float32)
    out[:, sentinel:] = np.cos(position_enc[:, 1::2]).astype(np.float32)
    return jnp.asarray(out)


def reference_score(hidden, wq, bq, wk, bk, pos_table, *, heads, tag_size, scale):
    """Pure-JAX transcription of the PyTorch forward (score computation), (B,L,L,T)."""
    B, L, H = hidden.shape
    T = tag_size
    D = H // heads
    table = pos_table[:L]
    sin = table[:, : D // 2][None, :, None, None, :]
    cos = table[:, D // 2:][None, :, None, None, :]

    q = (hidden @ wq.T + bq).reshape(B, L, T, heads, D)
    k = (hidden @ wk.T + bk).reshape(B, L, T, heads, D)

    def rot(x):
        x1, x2 = x[..., 0::2], x[..., 1::2]
        return jnp.concatenate([x1 * cos - x2 * sin, x2 * cos + x1 * sin], axis=-1)

    q = jnp.transpose(rot(q), (0, 2, 3, 1, 4))          # (B,T,heads,L,D)
    k = jnp.transpose(rot(k), (0, 2, 3, 4, 1))          # (B,T,heads,D,L)
    score = jnp.matmul(q, k) * scale                    # (B,T,heads,L,L)
    score = jnp.transpose(score, (0, 3, 4, 1, 2))       # (B,L,L,T,heads)
    return jnp.mean(score, axis=-1)                     # (B,L,L,T)


if __name__ == "__main__":
    def run_case(B, L, H, tag_size, max_len, compute_dtype, rtol, atol):
        heads = 12 if H == 768 else 16
        D = H // heads
        scale = float((H // 12) ** (-0.5))

        key = jax.random.PRNGKey(0)
        k1, k2, k3, k4, k5 = jax.random.split(key, 5)
        hidden = jax.random.normal(k1, (B, L, H), dtype=jnp.float32)
        wq = 0.05 * jax.random.normal(k2, (H * tag_size, H), dtype=jnp.float32)
        bq = 0.05 * jax.random.normal(k3, (H * tag_size,), dtype=jnp.float32)
        wk = 0.05 * jax.random.normal(k4, (H * tag_size, H), dtype=jnp.float32)
        bk = 0.05 * jax.random.normal(k5, (H * tag_size,), dtype=jnp.float32)
        pos_table = make_sinusoidal_table(max_len, D)

        ref = reference_score(hidden, wq, bq, wk, bk, pos_table,
                              heads=heads, tag_size=tag_size, scale=scale)
        ref_btll = jnp.transpose(ref, (0, 3, 1, 2))          # (B,T,L,L)

        out = ner_score_pallas(hidden, wq, bq, wk, bk, pos_table,
                               heads=heads, tag_size=tag_size, scale=scale,
                               compute_dtype=compute_dtype)
        out = jax.block_until_ready(out)
        np.testing.assert_allclose(np.asarray(out), np.asarray(ref_btll),
                                   rtol=rtol, atol=atol)

    # small config from the module (hidden=32): f32 matmul path, tight tolerance
    run_case(B=2, L=8, H=32, tag_size=4, max_len=16,
             compute_dtype=jnp.float32, rtol=1e-4, atol=1e-4)
    # same config on the default bf16 MXU path (half weight DMA, fast MXU)
    run_case(B=2, L=8, H=32, tag_size=4, max_len=16,
             compute_dtype=jnp.bfloat16, rtol=2e-2, atol=2e-2)
    # head-dim-aligned config (HD2 already a multiple of 128 -> no zero padding)
    run_case(B=2, L=8, H=256, tag_size=2, max_len=16,
             compute_dtype=jnp.bfloat16, rtol=2e-2, atol=2e-2)

    print("KERNEL_OK")
</pallas_src>

<mosaic_0001>
module attributes {stable_mosaic.version = 11 : i64} {
  func.func @kernel(%arg0: i32, %arg1: i32, %arg2: i32, %arg3: memref<2x128x32xf32, #tpu.memory_space<vmem>>, %arg4: memref<1x32x256xf32, #tpu.memory_space<vmem>>, %arg5: memref<1x1x256xf32, #tpu.memory_space<vmem>>, %arg6: memref<1x32x256xf32, #tpu.memory_space<vmem>>, %arg7: memref<1x1x256xf32, #tpu.memory_space<vmem>>, %arg8: memref<128x256xf32, #tpu.memory_space<vmem>>, %arg9: memref<128x256xf32, #tpu.memory_space<vmem>>, %arg10: memref<2x1x128x128xf32, #tpu.memory_space<vmem>>, %arg11: memref<2x128x256xf32, #tpu.memory_space<vmem>>) attributes {dimension_semantics = [#tpu.dimension_semantics<parallel>, #tpu.dimension_semantics<arbitrary>, #tpu.dimension_semantics<arbitrary>], iteration_bounds = array<i64: 4, 1, 1>, scalar_prefetch = 0 : i64, scratch_operands = 1 : i64, tpu.core_type = #tpu.core_type<tc>, window_params = [{transform_indices = @transform_0, window_bounds = array<i64: 2, 128, 32>}, {transform_indices = @transform_1, window_bounds = array<i64: 1, 32, 256>}, {transform_indices = @transform_2, window_bounds = array<i64: 1, 1, 256>}, {transform_indices = @transform_3, window_bounds = array<i64: 1, 32, 256>}, {transform_indices = @transform_4, window_bounds = array<i64: 1, 1, 256>}, {pipeline_mode = #tpu.pipeline_mode<synchronous>, transform_indices = @transform_5, window_bounds = array<i64: 128, 256>}, {pipeline_mode = #tpu.pipeline_mode<synchronous>, transform_indices = @transform_6, window_bounds = array<i64: 128, 256>}, {transform_indices = @transform_7, window_bounds = array<i64: 2, 1, 128, 128>}]} {
    %c0_i32 = arith.constant 0 : i32
    %0 = arith.cmpi eq, %arg2, %c0_i32 : i32
    %1 = arith.extui %0 : i1 to i32
    %c0_i32_0 = arith.constant 0 : i32
    %2 = arith.cmpi ne, %1, %c0_i32_0 : i32
    scf.if %2 {
      %c0_19 = arith.constant 0 : index
      %c0_20 = arith.constant 0 : index
      %c0_21 = arith.constant 0 : index
      %33 = vector.load %arg3[%c0_19, %c0_20, %c0_21] : memref<2x128x32xf32, #tpu.memory_space<vmem>>, vector<2x128x32xf32>
      %34 = vector.shape_cast %33 : vector<2x128x32xf32> to vector<256x32xf32>
      %c0_22 = arith.constant 0 : index
      %c0_23 = arith.constant 0 : index
      %c0_24 = arith.constant 0 : index
      %35 = vector.load %arg6[%c0_22, %c0_23, %c0_24] : memref<1x32x256xf32, #tpu.memory_space<vmem>>, vector<1x32x256xf32>
      %36 = vector.shape_cast %35 : vector<1x32x256xf32> to vector<32x256xf32>
      %cst_25 = arith.constant dense<0.000000e+00> : vector<256x256xf32>
      %37 = tpu.matmul %34, %36, %cst_25 {dimension_numbers = #tpu.dot_dimension_numbers<[1], [0], [0], [1], [0, 0, 1, 1], [], []>} : vector<256x32xf32>, vector<32x256xf32>, vector<256x256xf32> -> vector<256x256xf32>
      %c0_26 = arith.constant 0 : index
      %c0_27 = arith.constant 0 : index
      %c0_28 = arith.constant 0 : index
      %38 = vector.load %arg7[%c0_26, %c0_27, %c0_28] : memref<1x1x256xf32, #tpu.memory_space<vmem>>, vector<1x1x256xf32>
      %39 = vector.shape_cast %38 : vector<1x1x256xf32> to vector<1x256xf32>
      %40 = vector.broadcast %39 : vector<1x256xf32> to vector<256x256xf32>
      %41 = arith.addf %37, %40 : vector<256x256xf32>
      %42 = vector.shape_cast %41 : vector<256x256xf32> to vector<2x128x256xf32>
      %c0_29 = arith.constant 0 : index
      %c0_30 = arith.constant 0 : index
      %43 = vector.load %arg8[%c0_29, %c0_30] : memref<128x256xf32, #tpu.memory_space<vmem>>, vector<128x256xf32>
      %44 = vector.shape_cast %43 : vector<128x256xf32> to vector<1x128x256xf32>
      %c0_31 = arith.constant 0 : index
      %c0_32 = arith.constant 0 : index
      %45 = vector.load %arg9[%c0_31, %c0_32] : memref<128x256xf32, #tpu.memory_space<vmem>>, vector<128x256xf32>
      %46 = vector.shape_cast %45 : vector<128x256xf32> to vector<1x128x256xf32>
      %c128_i32_33 = arith.constant 128 : i32
      %47 = tpu.dynamic_rotate %42 by %c128_i32_33 dim 2 : vector<2x128x256xf32>, i32 -> vector<2x128x256xf32>
      %48 = vector.broadcast %44 : vector<1x128x256xf32> to vector<2x128x256xf32>
      %49 = arith.mulf %42, %48 : vector<2x128x256xf32>
      %50 = vector.broadcast %46 : vector<1x128x256xf32> to vector<2x128x256xf32>
      %51 = arith.mulf %47, %50 : vector<2x128x256xf32>
      %52 = arith.addf %49, %51 : vector<2x128x256xf32>
      %c0_34 = arith.constant 0 : index
      %c0_35 = arith.constant 0 : index
      %c0_36 = arith.constant 0 : index
      %53 = vector.load %arg11[%c0_34, %c0_35, %c0_36] : memref<2x128x256xf32, #tpu.memory_space<vmem>>, vector<2x128x256xf32>
      tpu.vector_store %arg11[%c0_34, %c0_35, %c0_36], %52 {strides = array<i32>} : memref<2x128x256xf32, #tpu.memory_space<vmem>>, vector<2x128x256xf32>,
    } else {
    }
    %c128_i32 = arith.constant 128 : i32
    %3 = arith.muli %arg2, %c128_i32 : i32
    %4 = tpu.assume_multiple %3, 128 : i32
    %c0 = arith.constant 0 : index
    %5 = arith.index_cast %4 : i32 to index
    %c0_1 = arith.constant 0 : index
    %6 = vector.load %arg3[%c0, %5, %c0_1] : memref<2x128x32xf32, #tpu.memory_space<vmem>>, vector<2x128x32xf32>
    %7 = vector.shape_cast %6 : vector<2x128x32xf32> to vector<256x32xf32>
    %c0_2 = arith.constant 0 : index
    %c0_3 = arith.constant 0 : index
    %c0_4 = arith.constant 0 : index
    %8 = vector.load %arg4[%c0_2, %c0_3, %c0_4] : memref<1x32x256xf32, #tpu.memory_space<vmem>>, vector<1x32x256xf32>
    %9 = vector.shape_cast %8 : vector<1x32x256xf32> to vector<32x256xf32>
    %cst = arith.constant dense<0.000000e+00> : vector<256x256xf32>
    %10 = tpu.matmul %7, %9, %cst {dimension_numbers = #tpu.dot_dimension_numbers<[1], [0], [0], [1], [0, 0, 1, 1], [], []>} : vector<256x32xf32>, vector<32x256xf32>, vector<256x256xf32> -> vector<256x256xf32>
    %c0_5 = arith.constant 0 : index
    %c0_6 = arith.constant 0 : index
    %c0_7 = arith.constant 0 : index
    %11 = vector.load %arg5[%c0_5, %c0_6, %c0_7] : memref<1x1x256xf32, #tpu.memory_space<vmem>>, vector<1x1x256xf32>
    %12 = vector.shape_cast %11 : vector<1x1x256xf32> to vector<1x256xf32>
    %13 = vector.broadcast %12 : vector<1x256xf32> to vector<256x256xf32>
    %14 = arith.addf %10, %13 : vector<256x256xf32>
    %15 = vector.shape_cast %14 : vector<256x256xf32> to vector<2x128x256xf32>
    %16 = arith.index_cast %4 : i32 to index
    %c0_8 = arith.constant 0 : index
    %17 = vector.load %arg8[%16, %c0_8] : memref<128x256xf32, #tpu.memory_space<vmem>>, vector<128x256xf32>
    %18 = vector.shape_cast %17 : vector<128x256xf32> to vector<1x128x256xf32>
    %19 = arith.index_cast %4 : i32 to index
    %c0_9 = arith.constant 0 : index
    %20 = vector.load %arg9[%19, %c0_9] : memref<128x256xf32, #tpu.memory_space<vmem>>, vector<128x256xf32>
    %21 = vector.shape_cast %20 : vector<128x256xf32> to vector<1x128x256xf32>
    %c128_i32_10 = arith.constant 128 : i32
    %22 = tpu.dynamic_rotate %15 by %c128_i32_10 dim 2 : vector<2x128x256xf32>, i32 -> vector<2x128x256xf32>
    %23 = vector.broadcast %18 : vector<1x128x256xf32> to vector<2x128x256xf32>
    %24 = arith.mulf %15, %23 : vector<2x128x256xf32>
    %25 = vector.broadcast %21 : vector<1x128x256xf32> to vector<2x128x256xf32>
    %26 = arith.mulf %22, %25 : vector<2x128x256xf32>
    %27 = arith.addf %24, %26 : vector<2x128x256xf32>
    %c0_11 = arith.constant 0 : index
    %c0_12 = arith.constant 0 : index
    %c0_13 = arith.constant 0 : index
    %28 = vector.load %arg11[%c0_11, %c0_12, %c0_13] : memref<2x128x256xf32, #tpu.memory_space<vmem>>, vector<2x128x256xf32>
    "tpu.trace_start"() <{level = 10 : i32, message = "bqd,bkd->bqk"}> : () -> ()
    %cst_14 = arith.constant dense<0.000000e+00> : vector<2x128x128xf32>
    %29 = tpu.matmul %27, %28, %cst_14 {dimension_numbers = #tpu.dot_dimension_numbers<[2], [2], [1], [1], [0, 0, 0, 1, 1, 1], [0], [0]>} : vector<2x128x256xf32>, vector<2x128x256xf32>, vector<2x128x128xf32> -> vector<2x128x128xf32>
    "tpu.trace_stop"() : () -> ()
    %c0_15 = arith.constant 0 : index
    %c0_16 = arith.constant 0 : index
    %c0_17 = arith.constant 0 : index
    %c0_18 = arith.constant 0 : index
    %30 = vector.load %arg10[%c0_15, %c0_16, %c0_17, %c0_18] : memref<2x1x128x128xf32, #tpu.memory_space<vmem>>, vector<2x1x128x128xf32>
    %31 = vector.shape_cast %30 : vector<2x1x128x128xf32> to vector<2x128x128xf32>
    %32 = vector.shape_cast %29 : vector<2x128x128xf32> to vector<2x1x128x128xf32>
    tpu.vector_store %arg10[%c0_15, %c0_16, %c0_17, %c0_18], %32 {strides = array<i32>} : memref<2x1x128x128xf32, #tpu.memory_space<vmem>>, vector<2x1x128x128xf32>,
    return
  }
  func.func @transform_0(%arg0: i32, %arg1: i32, %arg2: i32) -> (i32, i32, i32) {
    %c0_i32 = arith.constant 0 : i32
    %c0_i32_0 = arith.constant 0 : i32
    %c0_i32_1 = arith.constant 0 : i32
    return %arg1, %c0_i32, %c0_i32_0 : i32, i32, i32
  }
  func.func @transform_1(%arg0: i32, %arg1: i32, %arg2: i32) -> (i32, i32, i32) {
    %c0_i32 = arith.constant 0 : i32
    %c0_i32_0 = arith.constant 0 : i32
    %c0_i32_1 = arith.constant 0 : i32
    return %arg0, %c0_i32, %c0_i32_0 : i32, i32, i32
  }
  func.func @transform_2(%arg0: i32, %arg1: i32, %arg2: i32) -> (i32, i32, i32) {
    %c0_i32 = arith.constant 0 : i32
    %c0_i32_0 = arith.constant 0 : i32
    %c0_i32_1 = arith.constant 0 : i32
    return %arg0, %c0_i32, %c0_i32_0 : i32, i32, i32
  }
  func.func @transform_3(%arg0: i32, %arg1: i32, %arg2: i32) -> (i32, i32, i32) {
    %c0_i32 = arith.constant 0 : i32
    %c0_i32_0 = arith.constant 0 : i32
    %c0_i32_1 = arith.constant 0 : i32
    return %arg0, %c0_i32, %c0_i32_0 : i32, i32, i32
  }
  func.func @transform_4(%arg0: i32, %arg1: i32, %arg2: i32) -> (i32, i32, i32) {
    %c0_i32 = arith.constant 0 : i32
    %c0_i32_0 = arith.constant 0 : i32
    %c0_i32_1 = arith.constant 0 : i32
    return %arg0, %c0_i32, %c0_i32_0 : i32, i32, i32
  }
  func.func @transform_5(%arg0: i32, %arg1: i32, %arg2: i32) -> (i32, i32) {
    %c0_i32 = arith.constant 0 : i32
    %c0_i32_0 = arith.constant 0 : i32
    %c0_i32_1 = arith.constant 0 : i32
    return %c0_i32, %c0_i32_0 : i32, i32
  }
  func.func @transform_6(%arg0: i32, %arg1: i32, %arg2: i32) -> (i32, i32) {
    %c0_i32 = arith.constant 0 : i32
    %c0_i32_0 = arith.constant 0 : i32
    %c0_i32_1 = arith.constant 0 : i32
    return %c0_i32, %c0_i32_0 : i32, i32
  }
  func.func @transform_7(%arg0: i32, %arg1: i32, %arg2: i32) -> (i32, i32, i32, i32) {
    %c0_i32 = arith.constant 0 : i32
    %c0_i32_0 = arith.constant 0 : i32
    return %arg1, %arg0, %arg2, %c0_i32 : i32, i32, i32, i32
  }
}

</mosaic_0001>

<bundles_post_ra>
// kernel: tpu_custom_call.1
= control target key start
LH: loop header
LB: loop body
LE: loop exit
PB: predicated region body
PF: predicated region fallthrough
CT: control target
= control target key end

     0   :  { %s4162_s0 = inlined_call_operand.vmem [shape: f32[2,128,32], index: 0, kind: input, shape index: {}]   ;;  %s4163_s1 = inlined_call_operand.vmem [shape: f32[4,32,256], index: 1, kind: input, shape index: {}]   ;;  %s4164_s2 = inlined_call_operand.vmem [shape: f32[4,1,256], index: 2, kind: input, shape index: {}]   ;;  %s4165_s3 = inlined_call_operand.hbm [shape: f32[4,32,256], index: 3, kind: input, shape index: {}]   ;;  %s4166_s4 = inlined_call_operand.vmem [shape: f32[4,1,256], index: 4, kind: input, shape index: {}]   ;;  %s4167_s5 = inlined_call_operand.hbm [shape: f32[128,256], index: 5, kind: input, shape index: {}]   ;;  %s4168_s6 = inlined_call_operand.hbm [shape: f32[128,256], index: 6, kind: input, shape index: {}]   ;;  %s4169_s7 = inlined_call_operand.hbm [shape: f32[2,4,128,128], index: 7, kind: output, shape index: {}]  }
   0x1   :  { %4239 = sst [smem:[#allocation79_spill]] %s4167_s5 }
   0x2   :  { %4240 = sst [smem:[#allocation80_spill]] %s4168_s6 }
   0x3   :  { %12 = vsyncpa [#allocation4], 0 }
   0x4   :  { %14 = vsyncpa [#allocation4 + $0x1], 0 }
   0x5   :  { %15 = vsyncpa [#allocation7], 0 }
   0x6   :  { %16 = vsyncpa [#allocation5], 0 }
   0x7   :  { %18 = vsyncpa [#allocation5 + $0x1], 0  ;;  %s2809_s24 = smov 0   ;;  %s2811_s25 = smov 0  }
   0x8   :  { %s2813_s26 = smov 0   ;;  %s2815_s27 = smov 0  }
   0x9   :  { %s2817_s28 = smov 0   ;;  %s2819_s29 = smov 0  }
   0xa LB: > { %s2328_s30 = sadd.s32 4294967295, %s2756_s29   ;;  %s2329_s8 = sadd.s32 4294967294, %s2756_s29   ;;  %s2756_s29 = sphi %s2819_s29, %s24_s29   ;;  %s2752_s28 = sphi %s2817_s28, %s4390_s28   ;;  %s2748_s27 = sphi %s2815_s27, %s4389_s27   ;;  %s2744_s26 = sphi %s2813_s26, %s4388_s26   ;;  %s2740_s25 = sphi %s2811_s25, %s4387_s25   ;;  %s2736_s24 = sphi %s2809_s24, %s4386_s24  }
   0xb   : > { %p141_p0 = scmp.ne.s32.totalorder %s2740_s25, %s2736_s24  ;;  %p2845_p1 = scmp.eq.s32.totalorder %s2328_s30, 0 }
   0xc   : > { %p243_p2 = scmp.eq.s32.totalorder %s2329_s8, 3  ;;  %p2330_p4 = scmp.ge.s32.totalorder %s2756_s29, 1 }
   0xd   : > { %p2851_p3 = por %p2845_p1, %p141_p0  ;;  %p250_p6 = scmp.lt.s32.totalorder %s2756_s29, 5 }
   0xe   : > { %p2856_p5 = por %p243_p2, %p141_p0  ;;  %s4245_s5 = sld [smem:[#allocation79_spill]] }
   0xf   : > { %p2864_p7 = pnand %p2330_p4, %p250_p6  ;;  %s2758_s16 = smov [#allocation6]  }
  0x10   : > { %s4243_s11 = scalar_select %p2856_p5, 1, 0 }
  0x11   : > { %p2501_p8 = pneg %p2864_p7  ;;  %s273_s17 = sshll.u32 %s2758_s16, 4  ;;  %s274_s17 = int_to_ptr.vmem [resolvable:$true] %s273_s17 }
  0x12   : > { %4244 = sst [smem:[#allocation15_spill]] %s4243_s11  ;;  %s4170_s21 = smov 256  }
  0x13   : > { %p2502_p9 = pnand %p2501_p8, %p2845_p1  ;;  %s4247_s6 = sld [smem:[#allocation80_spill]] }
  0x14   : > { %s271_s14 = sshll.u32 %s4245_s5, 4  ;;  %s4171_s22 = smov 16   ;;  %s272_s14 = int_to_ptr.hbm [resolvable:$true] %s271_s14 }
  0x15   : > { %2504 = dma.hbm_to_vmem [thread:$0]  (!%p2502_p9), %s272_s14, 4096, %s274_s17, [#allocation7], %s4170_s21, %s4170_s21, %s4171_s22  }
  0x16   : > { %s2761_s23 = smov [#allocation8]   ;;  %p237_p10 = scmp.eq.s32.totalorder %s2328_s30, 3 }
  0x17   : > { %s287_s8 = sshll.u32 %s2761_s23, 4  ;;  %s43_s12 = sadd.s32 1, %s2752_s28  ;;  %s288_s8 = int_to_ptr.vmem [resolvable:$true] %s287_s8 }
  0x18   : > { %p45_p11 = scmp.ge.s32.totalorder %s43_s12, 4  ;;  %s128_s13 = sadd.s32 1, %s2744_s26 }
  0x19   : > { %s285_s20 = sshll.u32 %s4247_s6, 4  ;;  %p135_p12 = scmp.ne.s32.totalorder %s2744_s26, %s2740_s25  ;;  %s286_s20 = int_to_ptr.hbm [resolvable:$true] %s285_s20 }
  0x1a   : > { %2507 = dma.hbm_to_vmem [thread:$0]  (!%p2502_p9), %s286_s20, 4096, %s288_s8, [#allocation7], %s4170_s21, %s4170_s21, %s4171_s22  }
  0x1b   : > { %p136_p13 = scmp.eq.s32.totalorder %s2756_s29, 0  ;;  %s4392_s12 = smov (%p45_p11, %s43_s12), 0 }
  0x1c   : > { %4248 = sst [smem:[#allocation16_spill]] %s4392_s12  ;;  %p2890_p0 = por %p237_p10, %p135_p12 }
  0x1d   : > { %p2518_p2 = scmp.lt.s32.totalorder %s2756_s29, 4  ;;  %s125_s16 = ssub.s32 %s2752_s28, %s4392_s12 }
  0x1e   : > { %s316_s17 = sand.u32 1, %s2744_s26   ;;  %p126_p4 = scmp.eq.s32.totalorder %s125_s16, 0 }
  0x1f   : > { %p137_p6 = por %p136_p13, %p135_p12  ;;  %s2335_s18 = sshll.u32 %s316_s17, 6 }
  0x20   : > { %s2480_s30 = sshll.u32 %s2752_s28, 6  ;;  %s320_s22 = scalar_lea.vmem [#allocation3], %s2335_s18 }
  0x21   : > { %s2900_s19 = scalar_select %p126_p4, %s2744_s26, %s128_s13  }
  0x22   : > { %s325_s8 = scalar_lea.hbm %s4165_s3, %s2480_s30  ;;  %s328_s5 = sshll.u32 %s320_s22, 4  ;;  %s329_s5 = int_to_ptr.vmem [resolvable:$true] %s328_s5 }
  0x23   : > { %s326_s21 = sshll.u32 %s325_s8, 4  ;;  %p2509_p8 = pnand %p2518_p2, %p137_p6  ;;  %s327_s21 = int_to_ptr.hbm [resolvable:$true] %s326_s21 }
  0x24   : > { %s317_s6 = scalar_lea.sflag [#allocation4], %s316_s17  ;;  %s4250_s12 = smov 16  }
  0x25   : > { %s4251_s11 = smov 256   ;;  %347 = sbr.rel (%p2864_p7) target bundleno = 764 (0x2fc), region = 48 }
  0x26   : > { %2511 = dma.hbm_to_vmem [thread:$0]  (!%p2509_p8), %s327_s21, 1024, %s329_s5, %s317_s6, %s4251_s11, %s4251_s11, %s4250_s12  }
  0x2a   : > { %s2913_s13 = sand.u32 1, %s2740_s25  }
  0x2b   : > { %s2339_s16 = sshll.u32 %s2913_s13, 6  ;;  %s350_s22 = scalar_lea.sflag [#allocation4], %s2913_s13 }
  0x2c   : > { %s353_s18 = scalar_lea.vmem [#allocation3], %s2339_s16 }
  0x2d   : > { %2723 = dma.done.wait (%p2851_p3), %s350_s22, 1024  }
  0x2e   : > { %2725 = vsyncadd (%p2851_p3), %s350_s22, 4294966272 }
  0x2f   : > { %2727 = dma.done.wait (%p2845_p1), [#allocation7], 8192  }
  0x30   : > { %2729 = vsyncadd (%p2845_p1), [#allocation7], 4294959104  ;;  %v478_v0 = vld [vmem:[%s353_s18 + $0x30] sm:$0xff]  ;;  %v479_v1 = vld [vmem:[%s353_s18 + $0x38] sm:$0xff]  ;;  %vm486_vm0 = vcmask 261120   ;;  %p421_p1 = scmp.lt.s32.totalorder %s2748_s27, 3 }
  0x31   : > { %v476_v2 = vld [vmem:[%s353_s18 + $0x20] sm:$0xff]  ;;  %595 = vmatpush.msra.mxu0 %v478_v0  ;;  %708 = vmatpush.msra.mxu1 %v479_v1  ;;  %v477_v3 = vld [vmem:[%s353_s18 + $0x28] sm:$0xff]  ;;  %v474_v4 = vld [vmem:[%s353_s18 + $0x10] sm:$0xff]  ;;  %s2120_s12 = scalar_lea.sflag [#allocation5], %s2913_s13 }
  0x32   : > { %v475_v5 = vld [vmem:[%s353_s18 + $0x18] sm:$0xff]  ;;  %v472_v6 = vld [vmem:[%s353_s18] sm:$0xff]  ;;  %v473_v7 = vld [vmem:[%s353_s18 + $0x8] sm:$0xff]  ;;  %s3040_s9 = scalar_select %p421_p1, %s2748_s27, 3 }
  0x33   : > { %596 = vmatpush.msra.mxu0 %v476_v2  ;;  %709 = vmatpush.msra.mxu1 %v477_v3  ;;  %v2928_v8 = vld [vmem:[%s4162_s0] sm:$0xff]  ;;  %v2937_v9 = vld [vmem:[%s4162_s0 + $0x8] sm:$0xff]  ;;  %v2946_v10 = vld [vmem:[%s4162_s0 + $0x10] sm:$0xff] }
  0x34   : > { %v2955_v11 = vld [vmem:[%s4162_s0 + $0x18] sm:$0xff]  ;;  %v2964_v12 = vld [vmem:[%s4162_s0 + $0x20] sm:$0xff]  ;;  %v2973_v13 = vld [vmem:[%s4162_s0 + $0x28] sm:$0xff]  ;;  %s2481_s10 = sshll.u32 %s3040_s9, 6  ;;  %s2345_s18 = sshll.u32 %s3040_s9, 1 }
  0x35   : > { %597 = vmatpush.msra.mxu0 %v474_v4  ;;  %710 = vmatpush.msra.mxu1 %v475_v5  ;;  %v446_v14 = vld [vmem:[%s4162_s0 + $0x30] sm:$0xff]  ;;  %v447_v15 = vld [vmem:[%s4162_s0 + $0x38] sm:$0xff]  ;;  %v448_v16 = vld [vmem:[%s4162_s0 + $0x40] sm:$0xff]  ;;  %s425_s17 = scalar_lea.vmem %s4163_s1, %s2481_s10  ;;  %s433_s15 = scalar_lea.vmem %s4166_s4, %s2345_s18 }
  0x36   : > { %v449_v17 = vld [vmem:[%s4162_s0 + $0x48] sm:$0xff]  ;;  %v450_v18 = vld [vmem:[%s4162_s0 + $0x50] sm:$0xff]  ;;  %v451_v19 = vld [vmem:[%s4162_s0 + $0x58] sm:$0xff]  ;;  %s429_s20 = scalar_lea.vmem %s4164_s2, %s2345_s18 }
  0x37   : > { %598 = vmatpush.msra.mxu0 %v472_v6  ;;  %711 = vmatpush.msra.mxu1 %v473_v7  ;;  %v452_v20 = vld [vmem:[%s4162_s0 + $0x60] sm:$0xff]  ;;  %v453_v21 = vld [vmem:[%s4162_s0 + $0x68] sm:$0xff]  ;;  %v454_v22 = vld [vmem:[%s4162_s0 + $0x70] sm:$0xff] }
  0x38   : > { %2347 = vmatmul.msk.f32.vlgmr.msra.gmra.mxu0 %vm486_vm0, %v2928_v8  ;;  %2379 = vmatmul.msk.f32.vlgmr.msra.gmra.mxu1 %vm486_vm0, %v2928_v8  ;;  %v455_v23 = vld [vmem:[%s4162_s0 + $0x78] sm:$0xff]  ;;  %v456_v26 = vld [vmem:[%s4162_s0 + $0x80] sm:$0xff]  ;;  %v457_v29 = vld [vmem:[%s4162_s0 + $0x88] sm:$0xff] }
  0x39   : > { %v1169_v30 = vld [vmem:[%s425_s17 + $0x30] sm:$0xff]  ;;  %v1170_v31 = vld [vmem:[%s425_s17 + $0x38] sm:$0xff]  ;;  %v1167_v32 = vld [vmem:[%s425_s17 + $0x20] sm:$0xff] }
  0x3a   : > { %1286 = vmatpush.msra.mxu2 %v1169_v30  ;;  %1399 = vmatpush.msra.mxu3 %v1170_v31  ;;  %v1168_v33 = vld [vmem:[%s425_s17 + $0x28] sm:$0xff]  ;;  %v458_v36 = vld [vmem:[%s4162_s0 + $0x90] sm:$0xff]  ;;  %v1166_v38 = vld [vmem:[%s425_s17 + $0x18] sm:$0xff] }
  0x3b   : > { %v1165_v37 = vld [vmem:[%s425_s17 + $0x10] sm:$0xff]  ;;  %v1163_v39 = vld [vmem:[%s425_s17] sm:$0xff]  ;;  %v1164_v40 = vld [vmem:[%s425_s17 + $0x8] sm:$0xff] }
  0x3c   : > { %1287 = vmatpush.msra.mxu2 %v1167_v32  ;;  %1400 = vmatpush.msra.mxu3 %v1168_v33  ;;  %v459_v43 = vld [vmem:[%s4162_s0 + $0x98] sm:$0xff]  ;;  %v460_v46 = vld [vmem:[%s4162_s0 + $0xa0] sm:$0xff]  ;;  %v461_v49 = vld [vmem:[%s4162_s0 + $0xa8] sm:$0xff] }
  0x3d   : > { %v462_v52 = vld [vmem:[%s4162_s0 + $0xb0] sm:$0xff]  ;;  %v463_v55 = vld [vmem:[%s4162_s0 + $0xb8] sm:$0xff]  ;;  %v464_v58 = vld [vmem:[%s4162_s0 + $0xc0] sm:$0xff] }
  0x3e   : > { %1288 = vmatpush.msra.mxu2 %v1165_v37  ;;  %1401 = vmatpush.msra.mxu3 %v1166_v38  ;;  %v1137_v59 = vld [vmem:[%s4162_s0 + $0x30] sm:$0xff]  ;;  %v465_v62 = vld [vmem:[%s4162_s0 + $0xc8] sm:$0xff]  ;;  %v1138_v63 = vld [vmem:[%s4162_s0 + $0x38] sm:$0xff] }
  0x3f   : > { %v466_v2 = vld [vmem:[%s4162_s0 + $0xd0] sm:$0xff]  ;;  %v1139_v3 = vld [vmem:[%s4162_s0 + $0x40] sm:$0xff]  ;;  %v467_v6 = vld [vmem:[%s4162_s0 + $0xd8] sm:$0xff] }
  0x40   : > { %2348 = vmatmul.msk.f32.gmra.mxu0 %vm486_vm0, %v2937_v9  ;;  %2380 = vmatmul.msk.f32.gmra.mxu1 %vm486_vm0, %v2937_v9  ;;  %v1140_v7 = vld [vmem:[%s4162_s0 + $0x48] sm:$0xff]  ;;  %v3236_v30 = vld [vmem:[#allocation6 + $0xf0] sm:$0xff]  ;;  %v3240_v32 = vld [vmem:[#allocation6 + $0xf8] sm:$0xff] }
  0x41   : > { %1289 = vmatpush.msra.mxu2 %v1163_v39  ;;  %1402 = vmatpush.msra.mxu3 %v1164_v40  ;;  %4252 = vst [vmem:[#allocation17_spill] sm:$0xff] %v3236_v30  ;;  %v3238_v31 = vld [vmem:[#allocation8 + $0xf0] sm:$0xff]  ;;  %v3246_v39 = vld [vmem:[#allocation8 + $0xf8] sm:$0xff]  ;;  %v3248_v40 = vld [vmem:[#allocation6 + $0xe0] sm:$0xff] }
  0x42   : > { %2411 = vmatmul.msk.f32.vlgmr.msra.gmra.mxu2 %vm486_vm0, %v2928_v8  ;;  %2443 = vmatmul.msk.f32.vlgmr.msra.gmra.mxu3 %vm486_vm0, %v2928_v8  ;;  %4253 = vst [vmem:[#allocation18_spill] sm:$0xff] %v3238_v31 }
  0x43   : > { %4254 = vst [vmem:[#allocation19_spill] sm:$0xff] %v3240_v32 }
  0x44   : > { %4255 = vst [vmem:[#allocation20_spill] sm:$0xff] %v3246_v39 }
  0x45   : > { %4256 = vst [vmem:[#allocation21_spill] sm:$0xff] %v3248_v40 }
  0x48   : > { %2349 = vmatmul.msk.f32.gmra.mxu0 %vm486_vm0, %v2946_v10  ;;  %2381 = vmatmul.msk.f32.gmra.mxu1 %vm486_vm0, %v2946_v10 }
  0x4a   : > { %2412 = vmatmul.msk.f32.gmra.mxu2 %vm486_vm0, %v2937_v9  ;;  %2444 = vmatmul.msk.f32.gmra.mxu3 %vm486_vm0, %v2937_v9 }
  0x50   : > { %2350 = vmatmul.msk.f32.gmra.mxu0 %vm486_vm0, %v2955_v11  ;;  %2382 = vmatmul.msk.f32.gmra.mxu1 %vm486_vm0, %v2955_v11 }
  0x52   : > { %2413 = vmatmul.msk.f32.gmra.mxu2 %vm486_vm0, %v2946_v10  ;;  %2445 = vmatmul.msk.f32.gmra.mxu3 %vm486_vm0, %v2946_v10  ;;  %v468_v10 = vld [vmem:[%s4162_s0 + $0xe0] sm:$0xff] }
  0x58   : > { %2351 = vmatmul.msk.f32.gmra.mxu0 %vm486_vm0, %v2964_v12  ;;  %2383 = vmatmul.msk.f32.gmra.mxu1 %vm486_vm0, %v2964_v12 }
  0x5a   : > { %2414 = vmatmul.msk.f32.gmra.mxu2 %vm486_vm0, %v2955_v11  ;;  %2446 = vmatmul.msk.f32.gmra.mxu3 %vm486_vm0, %v2955_v11  ;;  %v1141_v11 = vld [vmem:[%s4162_s0 + $0x50] sm:$0xff] }
  0x60   : > { %2352 = vmatmul.msk.f32.gmra.mxu0 %vm486_vm0, %v2973_v13  ;;  %2384 = vmatmul.msk.f32.gmra.mxu1 %vm486_vm0, %v2973_v13 }
  0x62   : > { %2415 = vmatmul.msk.f32.gmra.mxu2 %vm486_vm0, %v2964_v12  ;;  %2447 = vmatmul.msk.f32.gmra.mxu3 %vm486_vm0, %v2964_v12 }
  0x68   : > { %2353 = vmatmul.msk.f32.gmra.mxu0 %vm486_vm0, %v446_v14  ;;  %2385 = vmatmul.msk.f32.gmra.mxu1 %vm486_vm0, %v446_v14  ;;  %v469_v14 = vld [vmem:[%s4162_s0 + $0xe8] sm:$0xff] }
  0x6a   : > { %2416 = vmatmul.msk.f32.gmra.mxu2 %vm486_vm0, %v2973_v13  ;;  %2448 = vmatmul.msk.f32.gmra.mxu3 %vm486_vm0, %v2973_v13 }
  0x70   : > { %2354 = vmatmul.msk.f32.gmra.mxu0 %vm486_vm0, %v447_v15  ;;  %2386 = vmatmul.msk.f32.gmra.mxu1 %vm486_vm0, %v447_v15  ;;  %v1142_v15 = vld [vmem:[%s4162_s0 + $0x58] sm:$0xff] }
  0x72   : > { %2417 = vmatmul.msk.f32.gmra.mxu2 %vm486_vm0, %v1137_v59  ;;  %2449 = vmatmul.msk.f32.gmra.mxu3 %vm486_vm0, %v1137_v59 }
  0x78   : > { %2355 = vmatmul.msk.f32.gmra.mxu0 %vm486_vm0, %v448_v16  ;;  %2387 = vmatmul.msk.f32.gmra.mxu1 %vm486_vm0, %v448_v16 }
  0x7a   : > { %2418 = vmatmul.msk.f32.gmra.mxu2 %vm486_vm0, %v1138_v63  ;;  %2450 = vmatmul.msk.f32.gmra.mxu3 %vm486_vm0, %v1138_v63  ;;  %v1144_v63 = vld [vmem:[%s4162_s0 + $0x68] sm:$0xff] }
  0x80   : > { %2356 = vmatmul.msk.f32.gmra.mxu0 %vm486_vm0, %v449_v17  ;;  %2388 = vmatmul.msk.f32.gmra.mxu1 %vm486_vm0, %v449_v17 }
  0x82   : > { %2419 = vmatmul.msk.f32.gmra.mxu2 %vm486_vm0, %v1139_v3  ;;  %2451 = vmatmul.msk.f32.gmra.mxu3 %vm486_vm0, %v1139_v3 }
  0x88   : > { %2357 = vmatmul.msk.f32.gmra.mxu0 %vm486_vm0, %v450_v18  ;;  %2389 = vmatmul.msk.f32.gmra.mxu1 %vm486_vm0, %v450_v18  ;;  %v470_v18 = vld [vmem:[%s4162_s0 + $0xf0] sm:$0xff] }
  0x8a   : > { %2420 = vmatmul.msk.f32.gmra.mxu2 %vm486_vm0, %v1140_v7  ;;  %2452 = vmatmul.msk.f32.gmra.mxu3 %vm486_vm0, %v1140_v7 }
  0x90   : > { %2358 = vmatmul.msk.f32.gmra.mxu0 %vm486_vm0, %v451_v19  ;;  %2390 = vmatmul.msk.f32.gmra.mxu1 %vm486_vm0, %v451_v19  ;;  %v480_v19 = vld [vmem:[%s433_s15] sm:$0x3]  ;;  %s2342_s15 = sshll.u32 %s2913_s13, 8 }
  0x91   : > { %s4025_s21 = scalar_lea.vmem [#allocation9], %s2342_s15 }
  0x92   : > { %2421 = vmatmul.msk.f32.gmra.mxu2 %vm486_vm0, %v1141_v11  ;;  %2453 = vmatmul.msk.f32.gmra.mxu3 %vm486_vm0, %v1141_v11 }
  0x98   : > { %2359 = vmatmul.msk.f32.gmra.mxu0 %vm486_vm0, %v452_v20  ;;  %2391 = vmatmul.msk.f32.gmra.mxu1 %vm486_vm0, %v452_v20  ;;  %v1143_v20 = vld [vmem:[%s4162_s0 + $0x60] sm:$0xff] }
  0x9a   : > { %2422 = vmatmul.msk.f32.gmra.mxu2 %vm486_vm0, %v1142_v15  ;;  %2454 = vmatmul.msk.f32.gmra.mxu3 %vm486_vm0, %v1142_v15  ;;  %v3271_v15 = vld [vmem:[#allocation6 + $0xd0] sm:$0xff] }
  0x9b   : > { %4260 = vst [vmem:[#allocation25_spill] sm:$0xff] %v3271_v15 }
  0xa0   : > { %2360 = vmatmul.msk.f32.gmra.mxu0 %vm486_vm0, %v453_v21  ;;  %2392 = vmatmul.msk.f32.gmra.mxu1 %vm486_vm0, %v453_v21  ;;  %v3229_v21 = vperm.slane %v480_v19, 0 }
  0xa2   : > { %2423 = vmatmul.msk.f32.gmra.mxu2 %vm486_vm0, %v1143_v20  ;;  %2455 = vmatmul.msk.f32.gmra.mxu3 %vm486_vm0, %v1143_v20 }
  0xa8   : > { %2361 = vmatmul.msk.f32.gmra.mxu0 %vm486_vm0, %v454_v22  ;;  %2393 = vmatmul.msk.f32.gmra.mxu1 %vm486_vm0, %v454_v22  ;;  %v3231_v22 = vperm.slane %v480_v19, 1 }
  0xaa   : > { %2424 = vmatmul.msk.f32.gmra.mxu2 %vm486_vm0, %v1144_v63  ;;  %2456 = vmatmul.msk.f32.gmra.mxu3 %vm486_vm0, %v1144_v63 }
  0xb0   : > { %2362 = vmatmul.msk.f32.gmra.mxu0 %vm486_vm0, %v455_v23  ;;  %2394 = vmatmul.msk.f32.gmra.mxu1 %vm486_vm0, %v455_v23  ;;  %v471_v23 = vld [vmem:[%s4162_s0 + $0xf8] sm:$0xff] }
  0xb5   : > { %v3029_v24 = vpop.f32.mrf.mxu0  ;;  %v3031_v25 = vpop.f32.mrf.mxu1 }
  0xb8   : > { %2363 = vmatmul.msk.f32.gmra.mxu0 %vm486_vm0, %v456_v26  ;;  %2395 = vmatmul.msk.f32.gmra.mxu1 %vm486_vm0, %v456_v26 }
  0xbd   : > { %v3043_v27 = vpop.f32.mrf.mxu0  ;;  %v3045_v28 = vpop.f32.mrf.mxu1 }
  0xc0   : > { %2364 = vmatmul.msk.f32.gmra.mxu0 %vm486_vm0, %v457_v29  ;;  %2396 = vmatmul.msk.f32.gmra.mxu1 %vm486_vm0, %v457_v29 }
  0xc5   : > { %v3055_v34 = vpop.f32.mrf.mxu0  ;;  %v3057_v35 = vpop.f32.mrf.mxu1 }
  0xc8   : > { %2365 = vmatmul.msk.f32.gmra.mxu0 %vm486_vm0, %v458_v36  ;;  %2397 = vmatmul.msk.f32.gmra.mxu1 %vm486_vm0, %v458_v36 }
  0xcd   : > { %v3068_v41 = vpop.f32.mrf.mxu0  ;;  %v3070_v42 = vpop.f32.mrf.mxu1 }
  0xd0   : > { %2366 = vmatmul.msk.f32.gmra.mxu0 %vm486_vm0, %v459_v43  ;;  %2398 = vmatmul.msk.f32.gmra.mxu1 %vm486_vm0, %v459_v43  ;;  %v3250_v43 = vld [vmem:[#allocation8 + $0xe0] sm:$0xff] }
  0xd1   : > { %4257 = vst [vmem:[#allocation22_spill] sm:$0xff] %v3250_v43 }
  0xd5   : > { %v3081_v44 = vpop.f32.mrf.mxu0  ;;  %v3083_v45 = vpop.f32.mrf.mxu1 }
  0xd8   : > { %2367 = vmatmul.msk.f32.gmra.mxu0 %vm486_vm0, %v460_v46  ;;  %2399 = vmatmul.msk.f32.gmra.mxu1 %vm486_vm0, %v460_v46 }
  0xdd   : > { %v3094_v47 = vpop.f32.mrf.mxu0  ;;  %v3096_v48 = vpop.f32.mrf.mxu1 }
  0xe0   : > { %2368 = vmatmul.msk.f32.gmra.mxu0 %vm486_vm0, %v461_v49  ;;  %2400 = vmatmul.msk.f32.gmra.mxu1 %vm486_vm0, %v461_v49 }
  0xe5   : > { %v3107_v50 = vpop.f32.mrf.mxu0  ;;  %v3109_v51 = vpop.f32.mrf.mxu1 }
  0xe8   : > { %2369 = vmatmul.msk.f32.gmra.mxu0 %vm486_vm0, %v462_v52  ;;  %2401 = vmatmul.msk.f32.gmra.mxu1 %vm486_vm0, %v462_v52 }
  0xed   : > { %v3120_v53 = vpop.f32.mrf.mxu0  ;;  %v3122_v54 = vpop.f32.mrf.mxu1 }
  0xf0   : > { %2370 = vmatmul.msk.f32.gmra.mxu0 %vm486_vm0, %v463_v55  ;;  %2402 = vmatmul.msk.f32.gmra.mxu1 %vm486_vm0, %v463_v55  ;;  %v3257_v55 = vld [vmem:[#allocation6 + $0xe8] sm:$0xff] }
  0xf1   : > { %4258 = vst [vmem:[#allocation23_spill] sm:$0xff] %v3257_v55 }
  0xf5   : > { %v3133_v56 = vpop.f32.mrf.mxu0  ;;  %v3135_v57 = vpop.f32.mrf.mxu1 }
  0xf8   : > { %2371 = vmatmul.msk.f32.gmra.mxu0 %vm486_vm0, %v464_v58  ;;  %2403 = vmatmul.msk.f32.gmra.mxu1 %vm486_vm0, %v464_v58  ;;  %v3259_v58 = vld [vmem:[#allocation8 + $0xe8] sm:$0xff] }
  0xf9   : > { %4259 = vst [vmem:[#allocation24_spill] sm:$0xff] %v3259_v58 }
  0xfd   : > { %v3147_v60 = vpop.f32.mrf.mxu0  ;;  %v3149_v61 = vpop.f32.mrf.mxu1 }
 0x100   : > { %2372 = vmatmul.msk.f32.gmra.mxu0 %vm486_vm0, %v465_v62  ;;  %2404 = vmatmul.msk.f32.gmra.mxu1 %vm486_vm0, %v465_v62 }
 0x105   : > { %v3161_v0 = vpop.f32.mrf.mxu0  ;;  %v3163_v1 = vpop.f32.mrf.mxu1 }
 0x108   : > { %2373 = vmatmul.msk.f32.gmra.mxu0 %vm486_vm0, %v466_v2  ;;  %2405 = vmatmul.msk.f32.gmra.mxu1 %vm486_vm0, %v466_v2 }
 0x10d   : > { %v3175_v4 = vpop.f32.mrf.mxu0  ;;  %v3177_v5 = vpop.f32.mrf.mxu1 }
 0x110   : > { %2374 = vmatmul.msk.f32.gmra.mxu0 %vm486_vm0, %v467_v6  ;;  %2406 = vmatmul.msk.f32.gmra.mxu1 %vm486_vm0, %v467_v6 }
 0x115   : > { %v3189_v8 = vpop.f32.mrf.mxu0  ;;  %v3191_v9 = vpop.f32.mrf.mxu1 }
 0x116   : > { %v750_v20 = vadd.f32 %v3191_v9, %v3231_v22  ;;  %v634_v9 = vadd.f32 %v3175_v4, %v3229_v21  ;;  %v3314_v4 = vld [vmem:[#allocation8 + $0xb0] sm:$0xff] }
 0x117   : > { %4271 = vst [vmem:[#allocation36_spill] sm:$0xff] %v3314_v4 }
 0x118   : > { %2375 = vmatmul.msk.f32.gmra.mxu0 %vm486_vm0, %v468_v10  ;;  %2407 = vmatmul.msk.f32.gmra.mxu1 %vm486_vm0, %v468_v10 }
 0x11d   : > { %v639_v12 = vpop.f32.mrf.mxu0  ;;  %v752_v13 = vpop.f32.mrf.mxu1 }
 0x11e   : > { %v640_v59 = vadd.f32 %v639_v12, %v3229_v21  ;;  %v753_v2 = vadd.f32 %v752_v13, %v3231_v22  ;;  %v3273_v12 = vld [vmem:[#allocation8 + $0xd0] sm:$0xff]  ;;  %v3277_v13 = vld [vmem:[#allocation6 + $0xd8] sm:$0xff] }
 0x11f   : > { %4261 = vst [vmem:[#allocation26_spill] sm:$0xff] %v3273_v12 }
 0x120   : > { %2376 = vmatmul.msk.f32.gmra.mxu0 %vm486_vm0, %v469_v14  ;;  %2408 = vmatmul.msk.f32.gmra.mxu1 %vm486_vm0, %v469_v14  ;;  %4262 = vst [vmem:[#allocation27_spill] sm:$0xff] %v3277_v13 }
 0x125   : > { %v642_v16 = vpop.f32.mrf.mxu0  ;;  %v755_v17 = vpop.f32.mrf.mxu1 }
 0x126   : > { %v643_v33 = vadd.f32 %v642_v16, %v3229_v21  ;;  %v756_v36 = vadd.f32 %v755_v17, %v3231_v22  ;;  %v3279_v16 = vld [vmem:[#allocation8 + $0xd8] sm:$0xff]  ;;  %v637_v17 = vadd.f32 %v3189_v8, %v3229_v21  ;;  %v3295_v8 = vld [vmem:[#allocation8 + $0xc0] sm:$0xff] }
 0x127   : > { %4263 = vst [vmem:[#allocation28_spill] sm:$0xff] %v3279_v16 }
 0x128   : > { %2377 = vmatmul.msk.f32.gmra.mxu0 %vm486_vm0, %v470_v18  ;;  %2409 = vmatmul.msk.f32.gmra.mxu1 %vm486_vm0, %v470_v18  ;;  %v901_v6 = vmul.f32 %v3248_v40, %v643_v33  ;;  %v965_v7 = vmul.f32 %v3250_v43, %v756_v36  ;;  %v902_v11 = vmul.f32 %v3257_v55, %v756_v36  ;;  %v3519_v55 = vld [vmem:[#allocation6 + $0x28] sm:$0xff] }
 0x129   : > { %v966_v14 = vmul.f32 %v3259_v58, %v643_v33  ;;  %v900_v36 = vmul.f32 %v3277_v13, %v753_v2  ;;  %4267 = vst [vmem:[#allocation32_spill] sm:$0xff] %v3295_v8 }
 0x12a   : > { %4302 = vst [vmem:[#allocation67_spill] sm:$0xff] %v3519_v55 }
 0x12b   : > { %v1030_v33 = vadd.f32 %v966_v14, %v902_v11  ;;  %v3320_v11 = vld [vmem:[#allocation8 + $0xb8] sm:$0xff]  ;;  %v631_v14 = vadd.f32 %v3161_v0, %v3229_v21  ;;  %v3336_v0 = vld [vmem:[#allocation8 + $0xa0] sm:$0xff] }
 0x12c   : > { %4273 = vst [vmem:[#allocation38_spill] sm:$0xff] %v3320_v11 }
 0x12d   : > { %v645_v26 = vpop.f32.mrf.mxu0  ;;  %v758_v29 = vpop.f32.mrf.mxu1  ;;  %4277 = vst [vmem:[#allocation42_spill] sm:$0xff] %v3336_v0 }
 0x12e   : > { %v646_v37 = vadd.f32 %v645_v26, %v3229_v21  ;;  %v759_v38 = vadd.f32 %v758_v29, %v3231_v22  ;;  %v899_v26 = vmul.f32 %v3271_v15, %v640_v59  ;;  %v963_v29 = vmul.f32 %v3273_v12, %v753_v2 }
 0x12f   : > { %v961_v2 = vmul.f32 %v3295_v8, %v750_v20  ;;  %v3439_v8 = vld [vmem:[#allocation6 + $0x50] sm:$0xff] }
 0x130   : > { %2378 = vmatmul.msk.f32.gmra.mxu0 %vm486_vm0, %v471_v23  ;;  %2410 = vmatmul.msk.f32.gmra.mxu1 %vm486_vm0, %v471_v23  ;;  %v903_v46 = vmul.f32 %v3236_v30, %v646_v37  ;;  %v967_v49 = vmul.f32 %v3238_v31, %v759_v38  ;;  %v904_v52 = vmul.f32 %v3240_v32, %v759_v38  ;;  %v3293_v38 = vld [vmem:[#allocation6 + $0xc0] sm:$0xff]  ;;  %v3534_v32 = vld [vmem:[#allocation6 + $0x10] sm:$0xff] }
 0x131   : > { %v968_v62 = vmul.f32 %v3246_v39, %v646_v37  ;;  %v1029_v23 = vadd.f32 %v965_v7, %v901_v6  ;;  %v964_v37 = vmul.f32 %v3279_v16, %v640_v59  ;;  %4266 = vst [vmem:[#allocation31_spill] sm:$0xff] %v3293_v38  ;;  %v747_v59 = vadd.f32 %v3177_v5, %v3231_v22  ;;  %v3318_v5 = vld [vmem:[#allocation6 + $0xb8] sm:$0xff] }
 0x132   : > { %v1031_v3 = vadd.f32 %v967_v49, %v903_v46  ;;  %v3297_v46 = vld [vmem:[#allocation6 + $0xc8] sm:$0xff]  ;;  %v897_v63 = vmul.f32 %v3293_v38, %v637_v17  ;;  %4272 = vst [vmem:[#allocation37_spill] sm:$0xff] %v3318_v5 }
 0x133   : > { %v1032_v10 = vadd.f32 %v968_v62, %v904_v52  ;;  %4268 = vst [vmem:[#allocation33_spill] sm:$0xff] %v3297_v46  ;;  %v3299_v49 = vld [vmem:[#allocation8 + $0xc8] sm:$0xff]  ;;  %v1145_v52 = vld [vmem:[%s4162_s0 + $0x70] sm:$0xff]  ;;  %v1027_v62 = vadd.f32 %v963_v29, %v899_v26  ;;  %v898_v6 = vmul.f32 %v3297_v46, %v750_v20 }
 0x134   : > { %1827 = vmatpush.xpose.msrb.mxu0 %v1031_v3  ;;  %4269 = vst [vmem:[#allocation34_spill] sm:$0xff] %v3299_v49  ;;  %v1028_v3 = vadd.f32 %v964_v37, %v900_v36  ;;  %v962_v7 = vmul.f32 %v3299_v49, %v637_v17  ;;  %2425 = vmatmul.msk.f32.gmra.mxu2 %vm486_vm0, %v1145_v52 }
 0x135   : > { %1892 = vmatpush.xpose.msrb.mxu1 %v1032_v10  ;;  %v3283_v18 = vpop.f32.mrf.mxu0  ;;  %v3285_v19 = vpop.f32.mrf.mxu1  ;;  %v3312_v10 = vld [vmem:[#allocation6 + $0xb0] sm:$0xff]  ;;  %2457 = vmatmul.msk.f32.gmra.mxu3 %vm486_vm0, %v1145_v52  ;;  %v1025_v26 = vadd.f32 %v961_v2, %v897_v63  ;;  %v896_v37 = vmul.f32 %v3318_v5, %v747_v59  ;;  %v960_v52 = vmul.f32 %v3320_v11, %v634_v9  ;;  %v1146_v63 = vld [vmem:[%s4162_s0 + $0x78] sm:$0xff] }
 0x136   : > { %4264 = vst [vmem:[#allocation29_spill] sm:$0xff] %v3283_v18  ;;  %v895_v29 = vmul.f32 %v3312_v10, %v634_v9  ;;  %v1026_v36 = vadd.f32 %v962_v7, %v898_v6  ;;  %v741_v9 = vadd.f32 %v3149_v61, %v3231_v22  ;;  %v3359_v61 = vld [vmem:[#allocation6 + $0x98] sm:$0xff] }
 0x137   : > { %4265 = vst [vmem:[#allocation30_spill] sm:$0xff] %v3285_v19  ;;  %v3340_v19 = vld [vmem:[#allocation8 + $0xa8] sm:$0xff]  ;;  %v1024_v7 = vadd.f32 %v960_v52, %v896_v37 }
 0x138   : > { %1828 = vmatpush.xpose.msrb.mxu0 %v1029_v23  ;;  %4270 = vst [vmem:[#allocation35_spill] sm:$0xff] %v3312_v10  ;;  %v744_v23 = vadd.f32 %v3163_v1, %v3231_v22  ;;  %v628_v1 = vadd.f32 %v3147_v60, %v3229_v21  ;;  %v958_v18 = vmul.f32 %v3340_v19, %v631_v14  ;;  %v3355_v60 = vld [vmem:[#allocation8 + $0x90] sm:$0xff] }
 0x139   : > { %1893 = vmatpush.xpose.msrb.mxu1 %v1030_v33  ;;  %v959_v33 = vmul.f32 %v3314_v4, %v747_v59  ;;  %4279 = vst [vmem:[#allocation44_spill] sm:$0xff] %v3340_v19  ;;  %v3394_v19 = vld [vmem:[#allocation6 + $0x70] sm:$0xff] }
 0x13a   : > { %v957_v6 = vmul.f32 %v3336_v0, %v744_v23  ;;  %4282 = vst [vmem:[#allocation47_spill] sm:$0xff] %v3394_v19 }
 0x13b   : > { %v1023_v59 = vadd.f32 %v959_v33, %v895_v29  ;;  %v3361_v29 = vld [vmem:[#allocation8 + $0x98] sm:$0xff]  ;;  %v625_v33 = vadd.f32 %v3133_v56, %v3229_v21  ;;  %v3377_v56 = vld [vmem:[#allocation8 + $0x80] sm:$0xff]  ;;  %4304 = vst [vmem:[#allocation69_spill] sm:$0xff] %v3534_v32 }
 0x13c   : > { %1829 = vmatpush.xpose.msrb.mxu0 %v1027_v62  ;;  %v3334_v62 = vld [vmem:[#allocation6 + $0xa0] sm:$0xff]  ;;  %2426 = vmatmul.msk.f32.gmra.mxu2 %vm486_vm0, %v1146_v63  ;;  %v956_v0 = vmul.f32 %v3361_v29, %v628_v1 }
 0x13d   : > { %1894 = vmatpush.xpose.msrb.mxu1 %v1028_v3  ;;  %v3324_v20 = vpop.f32.mrf.mxu0  ;;  %v3326_v17 = vpop.f32.mrf.mxu1  ;;  %4276 = vst [vmem:[#allocation41_spill] sm:$0xff] %v3334_v62  ;;  %v3338_v3 = vld [vmem:[#allocation6 + $0xa8] sm:$0xff]  ;;  %v893_v2 = vmul.f32 %v3334_v62, %v631_v14  ;;  %2458 = vmatmul.msk.f32.gmra.mxu3 %vm486_vm0, %v1146_v63  ;;  %v955_v63 = vmul.f32 %v3355_v60, %v741_v9 }
 0x13e   : > { %4274 = vst [vmem:[#allocation39_spill] sm:$0xff] %v3324_v20  ;;  %v892_v20 = vmul.f32 %v3359_v61, %v741_v9  ;;  %v3416_v62 = vpop.f32.mrf.mxu3 }
 0x13f   : > { %4275 = vst [vmem:[#allocation40_spill] sm:$0xff] %v3326_v17  ;;  %v3353_v17 = vld [vmem:[#allocation6 + $0x90] sm:$0xff]  ;;  %v1021_v37 = vadd.f32 %v957_v6, %v893_v2 }
 0x140   : > { %1830 = vmatpush.xpose.msrb.mxu0 %v1025_v26  ;;  %4278 = vst [vmem:[#allocation43_spill] sm:$0xff] %v3338_v3  ;;  %v894_v26 = vmul.f32 %v3338_v3, %v744_v23  ;;  %v891_v52 = vmul.f32 %v3353_v17, %v628_v1  ;;  %v3375_v3 = vld [vmem:[#allocation6 + $0x80] sm:$0xff]  ;;  %v735_v1 = vadd.f32 %v3122_v54, %v3231_v22  ;;  %v3400_v54 = vld [vmem:[#allocation6 + $0x78] sm:$0xff] }
 0x141   : > { %1895 = vmatpush.xpose.msrb.mxu1 %v1026_v36  ;;  %v738_v36 = vadd.f32 %v3135_v57, %v3231_v22  ;;  %v622_v57 = vadd.f32 %v3120_v53, %v3229_v21  ;;  %v889_v2 = vmul.f32 %v3375_v3, %v625_v33  ;;  %v3396_v53 = vld [vmem:[#allocation8 + $0x70] sm:$0xff]  ;;  %4284 = vst [vmem:[#allocation49_spill] sm:$0xff] %v3400_v54 }
 0x142   : > { %v1019_v9 = vadd.f32 %v955_v63, %v891_v52  ;;  %4283 = vst [vmem:[#allocation48_spill] sm:$0xff] %v3396_v53  ;;  %v3402_v52 = vld [vmem:[#allocation8 + $0x78] sm:$0xff] }
 0x143   : > { %v953_v6 = vmul.f32 %v3377_v56, %v738_v36  ;;  %4285 = vst [vmem:[#allocation50_spill] sm:$0xff] %v3402_v52 }
 0x144   : > { %1831 = vmatpush.xpose.msrb.mxu0 %v1023_v59  ;;  %v1022_v59 = vadd.f32 %v958_v18, %v894_v26  ;;  %v1147_v18 = vld [vmem:[%s4162_s0 + $0x80] sm:$0xff]  ;;  %v1020_v26 = vadd.f32 %v956_v0, %v892_v20  ;;  %v619_v20 = vadd.f32 %v3107_v50, %v3229_v21  ;;  %v888_v50 = vmul.f32 %v3400_v54, %v735_v1 }
 0x145   : > { %1896 = vmatpush.xpose.msrb.mxu1 %v1024_v7  ;;  %v3365_v23 = vpop.f32.mrf.mxu0  ;;  %v3367_v14 = vpop.f32.mrf.mxu1  ;;  %v3379_v7 = vld [vmem:[#allocation6 + $0x88] sm:$0xff]  ;;  %2427 = vmatmul.msk.f32.gmra.mxu2 %vm486_vm0, %v1147_v18  ;;  %v1017_v63 = vadd.f32 %v953_v6, %v889_v2  ;;  %v616_v6 = vadd.f32 %v3094_v47, %v3229_v21  ;;  %v3441_v47 = vld [vmem:[#allocation8 + $0x50] sm:$0xff] }
 0x146   : > { %4280 = vst [vmem:[#allocation45_spill] sm:$0xff] %v3365_v23  ;;  %2459 = vmatmul.msk.f32.gmra.mxu3 %vm486_vm0, %v1147_v18  ;;  %v951_v18 = vmul.f32 %v3396_v53, %v735_v1  ;;  %v3426_v2 = vld [vmem:[#allocation8 + $0x68] sm:$0xff]  ;;  %v3461_v46 = vpop.f32.mrf.mxu3 }
 0x147   : > { %4281 = vst [vmem:[#allocation46_spill] sm:$0xff] %v3367_v14  ;;  %v3381_v14 = vld [vmem:[#allocation8 + $0x88] sm:$0xff]  ;;  %v950_v10 = vmul.f32 %v3426_v2, %v619_v20 }
 0x148   : > { %1832 = vmatpush.xpose.msrb.mxu0 %v1021_v37  ;;  %v890_v37 = vmul.f32 %v3379_v7, %v738_v36  ;;  %v954_v23 = vmul.f32 %v3381_v14, %v625_v33  ;;  %v732_v36 = vadd.f32 %v3109_v51, %v3231_v22  ;;  %v3424_v51 = vld [vmem:[#allocation6 + $0x68] sm:$0xff] }
 0x149   : > { %1897 = vmatpush.xpose.msrb.mxu1 %v1022_v59  ;;  %v887_v59 = vmul.f32 %v3394_v19, %v622_v57  ;;  %4288 = vst [vmem:[#allocation53_spill] sm:$0xff] %v3424_v51 }
 0x14a   : > { %v1018_v4 = vadd.f32 %v954_v23, %v890_v37  ;;  %v1148_v23 = vld [vmem:[%s4162_s0 + $0x88] sm:$0xff]  ;;  %v886_v11 = vmul.f32 %v3424_v51, %v732_v36 }
 0x14b   : > { %v1015_v1 = vadd.f32 %v951_v18, %v887_v59  ;;  %v613_v59 = vadd.f32 %v3081_v44, %v3229_v21  ;;  %v726_v18 = vadd.f32 %v3083_v45, %v3231_v22  ;;  %v3469_v45 = vld [vmem:[#allocation6 + $0x48] sm:$0xff] }
 0x14c   : > { %1833 = vmatpush.xpose.msrb.mxu0 %v1019_v9  ;;  %v3414_v9 = vpop.f32.mrf.mxu2  ;;  %v1014_v49 = vadd.f32 %v950_v10, %v886_v11  ;;  %4292 = vst [vmem:[#allocation57_spill] sm:$0xff] %v3469_v45  ;;  %v1149_v10 = vld [vmem:[%s4162_s0 + $0x90] sm:$0xff]  ;;  %v723_v11 = vadd.f32 %v3070_v42, %v3231_v22  ;;  %v3490_v42 = vld [vmem:[#allocation6 + $0x38] sm:$0xff] }
 0x14d   : > { %1898 = vmatpush.xpose.msrb.mxu1 %v1020_v26  ;;  %v3406_v0 = vpop.f32.mrf.mxu0  ;;  %v3408_v33 = vpop.f32.mrf.mxu1  ;;  %v952_v26 = vmul.f32 %v3402_v52, %v622_v57  ;;  %v729_v57 = vadd.f32 %v3096_v48, %v3231_v22  ;;  %2428 = vmatmul.msk.f32.gmra.mxu2 %vm486_vm0, %v1148_v23  ;;  %v3445_v48 = vld [vmem:[#allocation6 + $0x58] sm:$0xff]  ;;  %v882_v12 = vmul.f32 %v3469_v45, %v726_v18 }
 0x14e   : > { %4286 = vst [vmem:[#allocation51_spill] sm:$0xff] %v3406_v0  ;;  %v3420_v0 = vld [vmem:[#allocation6 + $0x60] sm:$0xff]  ;;  %2460 = vmatmul.msk.f32.gmra.mxu3 %vm486_vm0, %v1148_v23  ;;  %v880_v43 = vmul.f32 %v3490_v42, %v723_v11 }
 0x14f   : > { %4287 = vst [vmem:[#allocation52_spill] sm:$0xff] %v3408_v33  ;;  %v3422_v33 = vld [vmem:[#allocation8 + $0x60] sm:$0xff]  ;;  %v885_v37 = vmul.f32 %v3420_v0, %v619_v20  ;;  %v1016_v5 = vadd.f32 %v952_v26, %v888_v50  ;;  %v883_v26 = vmul.f32 %v3439_v8, %v616_v6  ;;  %v947_v23 = vmul.f32 %v3441_v47, %v729_v57 }
 0x150   : > { %1834 = vmatpush.xpose.msrb.mxu0 %v1017_v63  ;;  %v949_v63 = vmul.f32 %v3422_v33, %v732_v36  ;;  %v884_v44 = vmul.f32 %v3445_v48, %v729_v57  ;;  %4296 = vst [vmem:[#allocation61_spill] sm:$0xff] %v3490_v42 }
 0x151   : > { %1899 = vmatpush.xpose.msrb.mxu1 %v1018_v4  ;;  %v3447_v4 = vld [vmem:[#allocation8 + $0x58] sm:$0xff] }
 0x152   : > { %v1013_v50 = vadd.f32 %v949_v63, %v885_v37  ;;  %v3471_v37 = vld [vmem:[#allocation8 + $0x48] sm:$0xff]  ;;  %v610_v63 = vadd.f32 %v3068_v41, %v3229_v21  ;;  %v3484_v41 = vld [vmem:[#allocation6 + $0x30] sm:$0xff] }
 0x153   : > { %4293 = vst [vmem:[#allocation58_spill] sm:$0xff] %v3471_v37  ;;  %v946_v13 = vmul.f32 %v3471_v37, %v613_v59 }
 0x154   : > { %1835 = vmatpush.xpose.msrb.mxu0 %v1015_v1  ;;  %v3459_v1 = vpop.f32.mrf.mxu2  ;;  %4294 = vst [vmem:[#allocation59_spill] sm:$0xff] %v3484_v41 }
 0x155   : > { %1900 = vmatpush.xpose.msrb.mxu1 %v1016_v5  ;;  %v3451_v36 = vpop.f32.mrf.mxu0  ;;  %v3453_v20 = vpop.f32.mrf.mxu1  ;;  %v948_v5 = vmul.f32 %v3447_v4, %v616_v6  ;;  %v1011_v6 = vadd.f32 %v947_v23, %v883_v26  ;;  %2429 = vmatmul.msk.f32.gmra.mxu2 %vm486_vm0, %v1149_v10  ;;  %v3492_v26 = vld [vmem:[#allocation8 + $0x38] sm:$0xff]  ;;  %v607_v23 = vadd.f32 %v3055_v34, %v3229_v21 }
 0x156   : > { %4289 = vst [vmem:[#allocation54_spill] sm:$0xff] %v3451_v36  ;;  %v3465_v36 = vld [vmem:[#allocation6 + $0x40] sm:$0xff]  ;;  %2461 = vmatmul.msk.f32.gmra.mxu3 %vm486_vm0, %v1149_v10  ;;  %v879_v10 = vmul.f32 %v3484_v41, %v610_v63  ;;  %v3511_v34 = vpop.f32.mrf.mxu3  ;;  %v1010_v15 = vadd.f32 %v946_v13, %v882_v12  ;;  %v717_v12 = vadd.f32 %v3045_v28, %v3231_v22  ;;  %v1150_v13 = vld [vmem:[%s4162_s0 + $0x98] sm:$0xff] }
 0x157   : > { %4290 = vst [vmem:[#allocation55_spill] sm:$0xff] %v3453_v20  ;;  %v3467_v20 = vld [vmem:[#allocation8 + $0x40] sm:$0xff]  ;;  %v881_v57 = vmul.f32 %v3465_v36, %v613_v59  ;;  %v1012_v38 = vadd.f32 %v948_v5, %v884_v44  ;;  %v720_v44 = vadd.f32 %v3057_v35, %v3231_v22  ;;  %v3538_v28 = vld [vmem:[#allocation6 + $0x18] sm:$0xff] }
 0x158   : > { %4291 = vst [vmem:[#allocation56_spill] sm:$0xff] %v3467_v20  ;;  %1836 = vmatpush.xpose.msrb.mxu0 %v1013_v50  ;;  %v945_v50 = vmul.f32 %v3467_v20, %v726_v18  ;;  %v1171_v35 = vld [vmem:[%s429_s20] sm:$0x3] }
 0x159   : > { %1901 = vmatpush.xpose.msrb.mxu1 %v1014_v49  ;;  %v3486_v49 = vld [vmem:[#allocation8 + $0x30] sm:$0xff]  ;;  %4297 = vst [vmem:[#allocation62_spill] sm:$0xff] %v3492_v26  ;;  %v3542_v39 = vperm.slane %v1171_v35, 1 }
 0x15a   : > { %4295 = vst [vmem:[#allocation60_spill] sm:$0xff] %v3486_v49  ;;  %v1009_v5 = vadd.f32 %v945_v50, %v881_v57  ;;  %v3521_v57 = vld [vmem:[#allocation8 + $0x28] sm:$0xff]  ;;  %v604_v50 = vadd.f32 %v3043_v27, %v3229_v21  ;;  %v3536_v27 = vld [vmem:[#allocation8 + $0x10] sm:$0xff] }
 0x15b   : > { %4303 = vst [vmem:[#allocation68_spill] sm:$0xff] %v3521_v57  ;;  %v942_v31 = vmul.f32 %v3521_v57, %v607_v23  ;;  %v939_v30 = vmul.f32 %v3536_v27, %v717_v12 }
 0x15c   : > { %1837 = vmatpush.xpose.msrb.mxu0 %v1011_v6  ;;  %v943_v6 = vmul.f32 %v3486_v49, %v723_v11  ;;  %v3509_v16 = vpop.f32.mrf.mxu2  ;;  %4305 = vst [vmem:[#allocation70_spill] sm:$0xff] %v3536_v27 }
 0x15d   : > { %1902 = vmatpush.xpose.msrb.mxu1 %v1012_v38  ;;  %v3501_v59 = vpop.f32.mrf.mxu0  ;;  %v3503_v18 = vpop.f32.mrf.mxu1  ;;  %v944_v38 = vmul.f32 %v3492_v26, %v610_v63  ;;  %4306 = vst [vmem:[#allocation71_spill] sm:$0xff] %v3538_v28  ;;  %2430 = vmatmul.msk.f32.gmra.mxu2 %vm486_vm0, %v1150_v13 }
 0x15e   : > { %4298 = vst [vmem:[#allocation63_spill] sm:$0xff] %v3501_v59  ;;  %v3515_v59 = vld [vmem:[#allocation6 + $0x20] sm:$0xff]  ;;  %v1007_v63 = vadd.f32 %v943_v6, %v879_v10  ;;  %2462 = vmatmul.msk.f32.gmra.mxu3 %vm486_vm0, %v1150_v13  ;;  %v3546_v10 = vld [vmem:[#allocation8 + $0x18] sm:$0xff]  ;;  %v876_v13 = vmul.f32 %v3538_v28, %v717_v12  ;;  %v1405_v12 = vadd.f32 %v3416_v62, %v3542_v39 }
 0x15f   : > { %4299 = vst [vmem:[#allocation64_spill] sm:$0xff] %v3503_v18  ;;  %v3517_v18 = vld [vmem:[#allocation8 + $0x20] sm:$0xff]  ;;  %v877_v11 = vmul.f32 %v3515_v59, %v607_v23  ;;  %v1008_v40 = vadd.f32 %v944_v38, %v880_v43  ;;  %v601_v43 = vadd.f32 %v3029_v24, %v3229_v21  ;;  %v714_v23 = vadd.f32 %v3031_v25, %v3231_v22  ;;  %v3563_v24 = vpop.f32.mrf.mxu3 }
 0x160   : > { %4300 = vst [vmem:[#allocation65_spill] sm:$0xff] %v3515_v59  ;;  %1838 = vmatpush.xpose.msrb.mxu0 %v1009_v5  ;;  %v941_v58 = vmul.f32 %v3517_v18, %v720_v44  ;;  %v878_v5 = vmul.f32 %v3519_v55, %v720_v44  ;;  %v940_v25 = vmul.f32 %v3546_v10, %v604_v50 }
 0x161   : > { %4301 = vst [vmem:[#allocation66_spill] sm:$0xff] %v3517_v18  ;;  %1903 = vmatpush.xpose.msrb.mxu1 %v1010_v15  ;;  %v3540_v15 = vperm.slane %v1171_v35, 0  ;;  %v875_v35 = vmul.f32 %v3534_v32, %v604_v50 }
 0x162   : > { %4307 = vst [vmem:[#allocation72_spill] sm:$0xff] %v3546_v10  ;;  %v1005_v38 = vadd.f32 %v941_v58, %v877_v11  ;;  %v1006_v52 = vadd.f32 %v942_v31, %v878_v5  ;;  %v3570_v58 = vld [vmem:[#allocation8 + $0x8] sm:$0xff]  ;;  %v1151_v31 = vld [vmem:[%s4162_s0 + $0xa0] sm:$0xff]  ;;  %v1004_v51 = vadd.f32 %v940_v25, %v876_v13 }
 0x163   : > { %4313 = vst [vmem:[#allocation78_spill] sm:$0xff] %v3570_v58  ;;  %v1292_v11 = vadd.f32 %v3414_v9, %v3540_v15  ;;  %v1003_v50 = vadd.f32 %v939_v30, %v875_v35  ;;  %v938_v19 = vmul.f32 %v3570_v58, %v601_v43  ;;  %v1295_v35 = vadd.f32 %v3459_v1, %v3540_v15 }
 0x164   : > { %1839 = vmatpush.xpose.msrb.mxu0 %v1007_v63  ;;  %v3559_v63 = vld [vmem:[#allocation6] sm:$0xff]  ;;  %v3561_v54 = vpop.f32.mrf.mxu2 }
 0x165   : > { %1904 = vmatpush.xpose.msrb.mxu1 %v1008_v40  ;;  %v3552_v44 = vpop.f32.mrf.mxu0  ;;  %v3554_v6 = vpop.f32.mrf.mxu1  ;;  %4310 = vst [vmem:[#allocation75_spill] sm:$0xff] %v3559_v63  ;;  %v3566_v40 = vld [vmem:[#allocation8] sm:$0xff]  ;;  %v1571_v9 = vmul.f32 %v1292_v11, %v3559_v63  ;;  %2431 = vmatmul.msk.f32.gmra.mxu2 %vm486_vm0, %v1151_v31  ;;  %v1638_v1 = vmul.f32 %v1295_v35, %v3546_v10 }
 0x166   : > { %4308 = vst [vmem:[#allocation73_spill] sm:$0xff] %v3552_v44  ;;  %v3568_v44 = vld [vmem:[#allocation6 + $0x8] sm:$0xff]  ;;  %v937_v5 = vmul.f32 %v3566_v40, %v714_v23  ;;  %v1635_v62 = vmul.f32 %v1405_v12, %v3566_v40  ;;  %2463 = vmatmul.msk.f32.gmra.mxu3 %vm486_vm0, %v1151_v31 }
 0x167   : > { %4309 = vst [vmem:[#allocation74_spill] sm:$0xff] %v3554_v6  ;;  %v873_v6 = vmul.f32 %v3559_v63, %v601_v43  ;;  %v874_v53 = vmul.f32 %v3568_v44, %v714_v23  ;;  %v1572_v30 = vmul.f32 %v1405_v12, %v3568_v44  ;;  %v3597_v25 = vpop.f32.mrf.mxu3 }
 0x168   : > { %4311 = vst [vmem:[#allocation76_spill] sm:$0xff] %v3566_v40  ;;  %1840 = vmatpush.xpose.msrb.mxu0 %v1005_v38  ;;  %v1699_v31 = vadd.f32 %v1635_v62, %v1571_v9  ;;  %v1298_v9 = vadd.f32 %v3509_v16, %v3540_v15  ;;  %v1153_v16 = vld [vmem:[%s4162_s0 + $0xb0] sm:$0xff] }
 0x169   : > { %4312 = vst [vmem:[#allocation77_spill] sm:$0xff] %v3568_v44  ;;  %1905 = vmatpush.xpose.msrb.mxu1 %v1006_v52  ;;  %v1636_v52 = vmul.f32 %v1292_v11, %v3570_v58  ;;  %v1001_v43 = vadd.f32 %v937_v5, %v873_v6  ;;  %v1002_v40 = vadd.f32 %v938_v19, %v874_v53 }
 0x16a   : > { %v1408_v11 = vadd.f32 %v3461_v46, %v3542_v39  ;;  %v1573_v6 = vmul.f32 %v1295_v35, %v3534_v32  ;;  %v1411_v35 = vadd.f32 %v3511_v34, %v3542_v39  ;;  %v1640_v34 = vmul.f32 %v1298_v9, %v3521_v57 }
 0x16b   : > { %v1700_v12 = vadd.f32 %v1636_v52, %v1572_v30 }
 0x16c   : > { %1841 = vmatpush.xpose.msrb.mxu0 %v1003_v50  ;;  %v3595_v13 = vpop.f32.mrf.mxu2  ;;  %v1574_v50 = vmul.f32 %v1408_v11, %v3538_v28  ;;  %v1637_v19 = vmul.f32 %v1408_v11, %v3536_v27  ;;  %v4317_v27 = vld [vmem:[#allocation50_spill] sm:$0xff] }
 0x16d   : > { %1906 = vmatpush.xpose.msrb.mxu1 %v1004_v51  ;;  %v3589_v38 = vpop.f32.mrf.mxu0  ;;  %v3591_v23 = vpop.f32.mrf.mxu1  ;;  %v1152_v51 = vld [vmem:[%s4162_s0 + $0xa8] sm:$0xff] }
 0x16e   : > { %2432 = vmatmul.msk.f32.gmra.mxu2 %vm486_vm0, %v1152_v51  ;;  %2464 = vmatmul.msk.f32.gmra.mxu3 %vm486_vm0, %v1152_v51  ;;  %v1701_v30 = vadd.f32 %v1637_v19, %v1573_v6  ;;  %v1575_v6 = vmul.f32 %v1298_v9, %v3515_v59  ;;  %v1301_v9 = vadd.f32 %v3561_v54, %v3540_v15  ;;  %v3730_v59 = vld [vmem:[#allocation8 + $0x80] sm:$0xff] }
 0x16f   : > { %v3616_v52 = vpop.f32.mrf.mxu3 }
 0x170   : > { %1842 = vmatpush.xpose.msrb.mxu0 %v1001_v43  ;;  %v1702_v43 = vadd.f32 %v1638_v1, %v1574_v50  ;;  %v1576_v1 = vmul.f32 %v1411_v35, %v3519_v55  ;;  %v1639_v50 = vmul.f32 %v1411_v35, %v3517_v18  ;;  %v1414_v35 = vadd.f32 %v3563_v24, %v3542_v39 }
 0x171   : > { %1907 = vmatpush.xpose.msrb.mxu1 %v1002_v40  ;;  %v1577_v54 = vmul.f32 %v1301_v9, %v3484_v41  ;;  %v3755_v41 = vld [vmem:[#allocation6 + $0x90] sm:$0xff] }
 0x172   : > { %v1641_v24 = vmul.f32 %v1414_v35, %v3486_v49  ;;  %v4323_v49 = vld [vmem:[#allocation18_spill] sm:$0xff] }
 0x173   : > { %1843 = vmatmul.f32.vlgmr.msrb.gmra.mxu0 %v1699_v31 }
 0x174   : > { %1908 = vmatmul.f32.vlgmr.msrb.gmra.mxu1 %v1700_v12  ;;  %v3614_v62 = vpop.f32.mrf.mxu2 }
 0x175   : > { %v672_v46 = vpop.f32.mrf.mxu0  ;;  %v785_v53 = vpop.f32.mrf.mxu1 }
 0x176   : > { %v673_v40 = vadd.f32 %v672_v46, %v3229_v21  ;;  %v786_v5 = vadd.f32 %v785_v53, %v3231_v22  ;;  %2433 = vmatmul.msk.f32.gmra.mxu2 %vm486_vm0, %v1153_v16  ;;  %2465 = vmatmul.msk.f32.gmra.mxu3 %vm486_vm0, %v1153_v16 }
 0x178   : > { %v921_v31 = vmul.f32 %v3375_v3, %v673_v40  ;;  %v986_v11 = vmul.f32 %v3381_v14, %v673_v40  ;;  %v922_v12 = vmul.f32 %v3379_v7, %v786_v5  ;;  %v985_v51 = vmul.f32 %v3377_v56, %v786_v5 }
 0x17a   : > { %v3627_v46 = vadd.f32 %v985_v51, %v921_v31  ;;  %v3629_v53 = vadd.f32 %v986_v11, %v922_v12  ;;  %v1422_v11 = vpop.f32.mrf.mxu3  ;;  %v1704_v12 = vadd.f32 %v1640_v34, %v1576_v1 }
 0x17b   : > { %1846 = vmatmul.f32.gmra.mxu0 %v1701_v30  ;;  %v1703_v30 = vadd.f32 %v1639_v50, %v1575_v6 }
 0x17c   : > { %1911 = vmatmul.f32.gmra.mxu1 %v1702_v43  ;;  %v1309_v31 = vpop.f32.mrf.mxu2 }
 0x17d   : > { %v675_v56 = vpop.f32.mrf.mxu0  ;;  %v788_v19 = vpop.f32.mrf.mxu1 }
 0x17e   : > { %v676_v40 = vadd.f32 %v675_v56, %v3229_v21  ;;  %v789_v5 = vadd.f32 %v788_v19, %v3231_v22  ;;  %v1154_v19 = vld [vmem:[%s4162_s0 + $0xb8] sm:$0xff] }
 0x17f   : > { %2434 = vmatmul.msk.f32.gmra.mxu2 %vm486_vm0, %v1154_v19  ;;  %2466 = vmatmul.msk.f32.gmra.mxu3 %vm486_vm0, %v1154_v19 }
 0x180   : > { %v923_v43 = vmul.f32 %v3353_v17, %v676_v40  ;;  %v988_v51 = vmul.f32 %v3361_v29, %v676_v40  ;;  %v924_v16 = vmul.f32 %v3359_v61, %v789_v5  ;;  %v987_v56 = vmul.f32 %v3355_v60, %v789_v5 }
 0x181   : > { %v1642_v17 = vmul.f32 %v1301_v9, %v3492_v26  ;;  %v1578_v60 = vmul.f32 %v1414_v35, %v3490_v42  ;;  %v1705_v40 = vadd.f32 %v1641_v24, %v1577_v54  ;;  %v1304_v5 = vadd.f32 %v3595_v13, %v3540_v15  ;;  %v1155_v9 = vld [vmem:[%s4162_s0 + $0xc0] sm:$0xff]  ;;  %v4322_v42 = vld [vmem:[#allocation19_spill] sm:$0xff] }
 0x182   : > { %v3650_v6 = vadd.f32 %v987_v56, %v923_v43  ;;  %v3652_v34 = vadd.f32 %v988_v51, %v924_v16  ;;  %v1425_v50 = vpop.f32.mrf.mxu3  ;;  %v1307_v24 = vadd.f32 %v3614_v62, %v3540_v15 }
 0x183   : > { %1849 = vmatmul.f32.gmra.mxu0 %v1703_v30  ;;  %v1417_v30 = vadd.f32 %v3597_v25, %v3542_v39  ;;  %v1579_v35 = vmul.f32 %v1304_v5, %v3465_v36  ;;  %v1644_v51 = vmul.f32 %v1304_v5, %v3471_v37  ;;  %v1426_v63 = vadd.f32 %v1425_v50, %v3542_v39 }
 0x184   : > { %1914 = vmatmul.f32.gmra.mxu1 %v1704_v12  ;;  %v1312_v1 = vpop.f32.mrf.mxu2  ;;  %v1706_v12 = vadd.f32 %v1642_v17, %v1578_v60  ;;  %v1420_v17 = vadd.f32 %v3616_v52, %v3542_v39  ;;  %v1581_v5 = vmul.f32 %v1307_v24, %v3439_v8 }
 0x185   : > { %v3660_v61 = vpop.f32.mrf.mxu0  ;;  %v3662_v29 = vpop.f32.mrf.mxu1  ;;  %v1643_v43 = vmul.f32 %v1417_v30, %v3467_v20  ;;  %v1580_v13 = vmul.f32 %v1417_v30, %v3469_v45  ;;  %v1313_v44 = vadd.f32 %v1312_v1, %v3540_v15 }
 0x186   : > { %v1645_v30 = vmul.f32 %v1420_v17, %v3441_v47  ;;  %v1582_v62 = vmul.f32 %v1420_v17, %v3445_v48 }
 0x187   : > { %2435 = vmatmul.msk.f32.gmra.mxu2 %vm486_vm0, %v1155_v9  ;;  %2467 = vmatmul.msk.f32.gmra.mxu3 %vm486_vm0, %v1155_v9  ;;  %v1707_v54 = vadd.f32 %v1643_v43, %v1579_v35  ;;  %v1708_v60 = vadd.f32 %v1644_v51, %v1580_v13  ;;  %v1310_v13 = vadd.f32 %v1309_v31, %v3540_v15 }
 0x188   : > { %v1709_v51 = vadd.f32 %v1645_v30, %v1581_v5  ;;  %v4314_v5 = vld [vmem:[#allocation53_spill] sm:$0xff]  ;;  %v1650_v32 = vmul.f32 %v1313_v44, %v4317_v27 }
 0x189   : > { %v1583_v17 = vmul.f32 %v1310_v13, %v3420_v0  ;;  %4319 = vst [vmem:[#allocation53_spill] sm:$0xff] %v3730_v59 }
 0x18a   : > { %v1428_v19 = vpop.f32.mrf.mxu3 }
 0x18b   : > { %1852 = vmatmul.f32.gmra.mxu0 %v1705_v40  ;;  %v1156_v40 = vld [vmem:[%s4162_s0 + $0xc8] sm:$0xff]  ;;  %v1429_v55 = vadd.f32 %v1428_v19, %v3542_v39 }
 0x18c   : > { %1917 = vmatmul.f32.gmra.mxu1 %v1706_v12  ;;  %v1315_v56 = vpop.f32.mrf.mxu2  ;;  %v1646_v12 = vmul.f32 %v1307_v24, %v3447_v4  ;;  %v1157_v24 = vld [vmem:[%s4162_s0 + $0xd0] sm:$0xff] }
 0x18d   : > { %v3677_v25 = vpop.f32.mrf.mxu0  ;;  %v3679_v16 = vpop.f32.mrf.mxu1 }
 0x18e   : > { %v1710_v58 = vadd.f32 %v1646_v12, %v1582_v62 }
 0x18f   : > { %2436 = vmatmul.msk.f32.gmra.mxu2 %vm486_vm0, %v1156_v40  ;;  %2468 = vmatmul.msk.f32.gmra.mxu3 %vm486_vm0, %v1156_v40  ;;  %v1648_v40 = vmul.f32 %v1310_v13, %v3426_v2  ;;  %v4315_v13 = vld [vmem:[#allocation47_spill] sm:$0xff] }
 0x190   : > { %4324 = vst [vmem:[#allocation47_spill] sm:$0xff] %v3755_v41 }
 0x192   : > { %v1431_v43 = vpop.f32.mrf.mxu3 }
 0x193   : > { %1855 = vmatmul.f32.gmra.mxu0 %v1707_v54  ;;  %v1423_v54 = vadd.f32 %v1422_v11, %v3542_v39 }
 0x194   : > { %1920 = vmatmul.f32.gmra.mxu1 %v1708_v60  ;;  %v1318_v35 = vpop.f32.mrf.mxu2 }
 0x195   : > { %v3694_v52 = vpop.f32.mrf.mxu0  ;;  %v3696_v9 = vpop.f32.mrf.mxu1  ;;  %v1647_v60 = vmul.f32 %v1423_v54, %v3422_v33  ;;  %v1584_v30 = vmul.f32 %v1423_v54, %v4314_v5  ;;  %v1585_v54 = vmul.f32 %v1313_v44, %v4315_v13  ;;  %v1159_v44 = vld [vmem:[%s4162_s0 + $0xe0] sm:$0xff] }
 0x197   : > { %2437 = vmatmul.msk.f32.gmra.mxu2 %vm486_vm0, %v1157_v24  ;;  %2469 = vmatmul.msk.f32.gmra.mxu3 %vm486_vm0, %v1157_v24  ;;  %v1712_v10 = vadd.f32 %v1648_v40, %v1584_v30  ;;  %v4316_v24 = vld [vmem:[#allocation48_spill] sm:$0xff]  ;;  %v1316_v40 = vadd.f32 %v1315_v56, %v3540_v15  ;;  %v1588_v56 = vmul.f32 %v1429_v55, %v3379_v7 }
 0x198   : > { %v1649_v28 = vmul.f32 %v1426_v63, %v4316_v24 }
 0x19a   : > { %v3711_v62 = vpop.f32.mrf.mxu3  ;;  %v1713_v57 = vadd.f32 %v1649_v28, %v1585_v54 }
 0x19b   : > { %1858 = vmatmul.f32.gmra.mxu0 %v1709_v51  ;;  %v1711_v51 = vadd.f32 %v1647_v60, %v1583_v17  ;;  %v4318_v17 = vld [vmem:[#allocation49_spill] sm:$0xff] }
 0x19c   : > { %1923 = vmatmul.f32.gmra.mxu1 %v1710_v58  ;;  %v3709_v12 = vpop.f32.mrf.mxu2  ;;  %v1158_v58 = vld [vmem:[%s4162_s0 + $0xd8] sm:$0xff]  ;;  %v1586_v60 = vmul.f32 %v1426_v63, %v4318_v17  ;;  %v1652_v63 = vmul.f32 %v1316_v40, %v3381_v14 }
 0x19d   : > { %v687_v31 = vpop.f32.mrf.mxu0  ;;  %v800_v11 = vpop.f32.mrf.mxu1 }
 0x19e   : > { %v1714_v18 = vadd.f32 %v1650_v32, %v1586_v60  ;;  %v1716_v60 = vadd.f32 %v1652_v63, %v1588_v56  ;;  %v688_v37 = vadd.f32 %v687_v31, %v3229_v21  ;;  %v4326_v63 = vld [vmem:[#allocation21_spill] sm:$0xff]  ;;  %v4327_v56 = vld [vmem:[#allocation24_spill] sm:$0xff]  ;;  %v1160_v31 = vld [vmem:[%s4162_s0 + $0xe8] sm:$0xff] }
 0x19f   : > { %2438 = vmatmul.msk.f32.gmra.mxu2 %vm486_vm0, %v1158_v58  ;;  %2470 = vmatmul.msk.f32.gmra.mxu3 %vm486_vm0, %v1158_v58  ;;  %v1651_v58 = vmul.f32 %v3730_v59, %v1429_v55  ;;  %v4321_v59 = vld [vmem:[#allocation20_spill] sm:$0xff] }
 0x1a3   : > { %1861 = vmatmul.f32.gmra.mxu0 %v1711_v51  ;;  %v3727_v51 = vpop.f32.mrf.mxu3 }
 0x1a4   : > { %1926 = vmatmul.f32.gmra.mxu1 %v1712_v10  ;;  %v3725_v30 = vpop.f32.mrf.mxu2  ;;  %v1587_v10 = vmul.f32 %v1316_v40, %v3375_v3  ;;  %v1432_v40 = vadd.f32 %v1431_v43, %v3542_v39 }
 0x1a5   : > { %v690_v1 = vpop.f32.mrf.mxu0  ;;  %v803_v50 = vpop.f32.mrf.mxu1 }
 0x1a6   : > { %v691_v32 = vadd.f32 %v690_v1, %v3229_v21  ;;  %v804_v19 = vadd.f32 %v803_v50, %v3231_v22  ;;  %v1715_v55 = vadd.f32 %v1651_v58, %v1587_v10  ;;  %v801_v10 = vadd.f32 %v800_v11, %v3231_v22  ;;  %v3763_v58 = vld [vmem:[#allocation8 + $0x98] sm:$0xff] }
 0x1a7   : > { %2439 = vmatmul.msk.f32.gmra.mxu2 %vm486_vm0, %v1159_v44  ;;  %2471 = vmatmul.msk.f32.gmra.mxu3 %vm486_vm0, %v1159_v44  ;;  %v4320_v44 = vld [vmem:[#allocation17_spill] sm:$0xff] }
 0x1a8   : > { %v998_v43 = vmul.f32 %v4327_v56, %v691_v32 }
 0x1ab   : > { %1864 = vmatmul.f32.gmra.mxu0 %v1713_v57  ;;  %v3747_v7 = vpop.f32.mrf.mxu3 }
 0x1ac   : > { %1929 = vmatmul.f32.gmra.mxu1 %v1714_v18  ;;  %v3745_v14 = vpop.f32.mrf.mxu2  ;;  %v1319_v18 = vadd.f32 %v1318_v35, %v3540_v15  ;;  %v933_v35 = vmul.f32 %v4326_v63, %v691_v32  ;;  %v685_v32 = vadd.f32 %v3694_v52, %v3229_v21 }
 0x1ad   : > { %v693_v28 = vpop.f32.mrf.mxu0  ;;  %v806_v3 = vpop.f32.mrf.mxu1 }
 0x1ae   : > { %v694_v54 = vadd.f32 %v693_v28, %v3229_v21  ;;  %v807_v57 = vadd.f32 %v806_v3, %v3231_v22  ;;  %v3757_v3 = vld [vmem:[#allocation8 + $0x90] sm:$0xff]  ;;  %v1589_v11 = vmul.f32 %v3755_v41, %v1319_v18 }
 0x1af   : > { %4325 = vst [vmem:[#allocation48_spill] sm:$0xff] %v3757_v3  ;;  %v1653_v63 = vmul.f32 %v3757_v3, %v1432_v40  ;;  %2440 = vmatmul.msk.f32.gmra.mxu2 %vm486_vm0, %v1160_v31  ;;  %2472 = vmatmul.msk.f32.gmra.mxu3 %vm486_vm0, %v1160_v31  ;;  %v4333_v3 = vld [vmem:[#allocation26_spill] sm:$0xff]  ;;  %v4336_v31 = vld [vmem:[#allocation33_spill] sm:$0xff] }
 0x1b0   : > { %v935_v1 = vmul.f32 %v4320_v44, %v694_v54  ;;  %v1000_v26 = vmul.f32 %v4321_v59, %v694_v54  ;;  %v936_v50 = vmul.f32 %v4322_v42, %v807_v57  ;;  %v999_v28 = vmul.f32 %v4323_v49, %v807_v57  ;;  %v4328_v44 = vld [vmem:[#allocation23_spill] sm:$0xff]  ;;  %v4329_v54 = vld [vmem:[#allocation22_spill] sm:$0xff]  ;;  %v3767_v57 = vld [vmem:[#allocation6 + $0x98] sm:$0xff] }
 0x1b1   : > { %v934_v59 = vmul.f32 %v4328_v44, %v804_v19  ;;  %v997_v42 = vmul.f32 %v4329_v54, %v804_v19  ;;  %v798_v19 = vadd.f32 %v3696_v9, %v3231_v22  ;;  %v1590_v56 = vmul.f32 %v3767_v57, %v1432_v40  ;;  %v4332_v44 = vld [vmem:[#allocation27_spill] sm:$0xff]  ;;  %v3796_v40 = vld [vmem:[#allocation6 + $0xa0] sm:$0xff] }
 0x1b2   : > { %v1063_v45 = vadd.f32 %v999_v28, %v935_v1  ;;  %v1064_v49 = vadd.f32 %v1000_v26, %v936_v50  ;;  %v1654_v26 = vmul.f32 %v3763_v58, %v1319_v18  ;;  %v4330_v1 = vld [vmem:[#allocation25_spill] sm:$0xff]  ;;  %v4331_v28 = vld [vmem:[#allocation28_spill] sm:$0xff]  ;;  %v932_v54 = vmul.f32 %v4332_v44, %v801_v10 }
 0x1b3   : > { %1867 = vmatmul.f32.gmra.mxu0 %v1715_v55  ;;  %v931_v50 = vmul.f32 %v4330_v1, %v688_v37  ;;  %v996_v55 = vmul.f32 %v4331_v28, %v688_v37  ;;  %v995_v52 = vmul.f32 %v4333_v3, %v801_v10  ;;  %v1061_v41 = vadd.f32 %v997_v42, %v933_v35  ;;  %v3798_v3 = vld [vmem:[#allocation8 + $0xa0] sm:$0xff]  ;;  %v4334_v35 = vld [vmem:[#allocation31_spill] sm:$0xff] }
 0x1b4   : > { %1957 = vmatpush.xpose.msrb.mxu2 %v1063_v45  ;;  %2022 = vmatpush.xpose.msrb.mxu3 %v1064_v49  ;;  %v1062_v20 = vadd.f32 %v998_v43, %v934_v59  ;;  %v3786_v9 = vpop.f32.mrf.mxu2  ;;  %v3788_v45 = vpop.f32.mrf.mxu3  ;;  %v1717_v18 = vadd.f32 %v1653_v63, %v1589_v11  ;;  %v1322_v49 = vadd.f32 %v3709_v12, %v3540_v15  ;;  %v4335_v59 = vld [vmem:[#allocation34_spill] sm:$0xff]  ;;  %v1161_v28 = vld [vmem:[%s4162_s0 + $0xf0] sm:$0xff] }
 0x1b5   : > { %1932 = vmatmul.f32.gmra.mxu1 %v1716_v60  ;;  %v1435_v37 = vadd.f32 %v3711_v62, %v3542_v39  ;;  %v682_v60 = vadd.f32 %v3677_v25, %v3229_v21  ;;  %v795_v10 = vadd.f32 %v3679_v16, %v3231_v22  ;;  %v929_v43 = vmul.f32 %v4334_v35, %v685_v32  ;;  %v4337_v62 = vld [vmem:[#allocation32_spill] sm:$0xff] }
 0x1b6   : > { %v994_v42 = vmul.f32 %v4335_v59, %v685_v32  ;;  %v1718_v12 = vadd.f32 %v1654_v26, %v1590_v56  ;;  %v930_v11 = vmul.f32 %v4336_v31, %v798_v19  ;;  %v993_v63 = vmul.f32 %v4337_v62, %v798_v19  ;;  %v4339_v56 = vld [vmem:[#allocation38_spill] sm:$0xff]  ;;  %v4341_v59 = vld [vmem:[#allocation36_spill] sm:$0xff] }
 0x1b7   : > { %v1059_v1 = vadd.f32 %v995_v52, %v931_v50  ;;  %v1060_v25 = vadd.f32 %v996_v55, %v932_v54  ;;  %v1591_v16 = vmul.f32 %v3796_v40, %v1322_v49  ;;  %v1655_v32 = vmul.f32 %v3798_v3, %v1435_v37  ;;  %2441 = vmatmul.msk.f32.gmra.mxu2 %vm486_vm0, %v1161_v28  ;;  %v4338_v50 = vld [vmem:[#allocation35_spill] sm:$0xff] }
 0x1b8   : > { %1958 = vmatpush.xpose.msrb.mxu2 %v1061_v41  ;;  %2023 = vmatpush.xpose.msrb.mxu3 %v1062_v20  ;;  %v3806_v41 = vld [vmem:[#allocation8 + $0xa8] sm:$0xff]  ;;  %v679_v19 = vadd.f32 %v3660_v61, %v3229_v21  ;;  %v792_v26 = vadd.f32 %v3662_v29, %v3231_v22  ;;  %v927_v55 = vmul.f32 %v4338_v50, %v682_v60 }
 0x1b9   : > { %v3808_v20 = vld [vmem:[#allocation6 + $0xa8] sm:$0xff]  ;;  %v992_v44 = vmul.f32 %v4339_v56, %v682_v60  ;;  %v1656_v54 = vmul.f32 %v3806_v41, %v1322_v49  ;;  %2473 = vmatmul.msk.f32.gmra.mxu3 %vm486_vm0, %v1161_v28  ;;  %v991_v61 = vmul.f32 %v4341_v59, %v795_v10  ;;  %v1057_v31 = vadd.f32 %v993_v63, %v929_v43  ;;  %v1162_v59 = vld [vmem:[%s4162_s0 + $0xf8] sm:$0xff] }
 0x1ba   : > { %v1592_v52 = vmul.f32 %v3808_v20, %v1435_v37  ;;  %v1058_v62 = vadd.f32 %v994_v42, %v930_v11  ;;  %v1325_v60 = vadd.f32 %v3725_v30, %v3540_v15  ;;  %v1438_v49 = vadd.f32 %v3727_v51, %v3542_v39  ;;  %v3835_v37 = vld [vmem:[#allocation6 + $0xb0] sm:$0xff]  ;;  %v4343_v42 = vld [vmem:[#allocation44_spill] sm:$0xff] }
 0x1bb   : > { %1870 = vmatmul.f32.gmra.mxu0 %v1717_v18  ;;  %v4340_v18 = vld [vmem:[#allocation37_spill] sm:$0xff]  ;;  %v990_v11 = vmul.f32 %v4343_v42, %v679_v19  ;;  %v1055_v56 = vadd.f32 %v991_v61, %v927_v55  ;;  %v3845_v51 = vld [vmem:[#allocation6 + $0xb8] sm:$0xff]  ;;  %v783_v42 = vadd.f32 %v3591_v23, %v3231_v22 }
 0x1bc   : > { %1959 = vmatpush.xpose.msrb.mxu2 %v1059_v1  ;;  %2024 = vmatpush.xpose.msrb.mxu3 %v1060_v25  ;;  %v928_v35 = vmul.f32 %v4340_v18, %v795_v10  ;;  %v3827_v29 = vpop.f32.mrf.mxu2  ;;  %v3829_v50 = vpop.f32.mrf.mxu3  ;;  %v1719_v1 = vadd.f32 %v1655_v32, %v1591_v16  ;;  %v4342_v10 = vld [vmem:[#allocation41_spill] sm:$0xff]  ;;  %v1720_v63 = vadd.f32 %v1656_v54, %v1592_v52  ;;  %v4344_v25 = vld [vmem:[#allocation43_spill] sm:$0xff]  ;;  %v4345_v16 = vld [vmem:[#allocation42_spill] sm:$0xff] }
 0x1bd   : > { %1935 = vmatmul.f32.gmra.mxu1 %v1718_v12  ;;  %v3837_v12 = vld [vmem:[#allocation8 + $0xb0] sm:$0xff]  ;;  %v925_v43 = vmul.f32 %v4342_v10, %v679_v19  ;;  %v926_v28 = vmul.f32 %v4344_v25, %v792_v26  ;;  %v989_v32 = vmul.f32 %v4345_v16, %v792_v26  ;;  %v3843_v18 = vld [vmem:[#allocation8 + $0xb8] sm:$0xff]  ;;  %v1594_v55 = vmul.f32 %v3845_v51, %v1438_v49  ;;  %v4346_v25 = vld [vmem:[#allocation73_spill] sm:$0xff] }
 0x1be   : > { %v1056_v30 = vadd.f32 %v992_v44, %v928_v35  ;;  %v1657_v19 = vmul.f32 %v3837_v12, %v1438_v49  ;;  %v1658_v26 = vmul.f32 %v3843_v18, %v1325_v60  ;;  %v3866_v49 = vld [vmem:[#allocation8 + $0xc0] sm:$0xff] }
 0x1bf   : > { %2442 = vmatmul.msk.f32.gmra.mxu2 %vm486_vm0, %v1162_v59  ;;  %v1053_v44 = vadd.f32 %v989_v32, %v925_v43  ;;  %v1054_v54 = vadd.f32 %v990_v11, %v926_v28  ;;  %v670_v43 = vadd.f32 %v3589_v38, %v3229_v21  ;;  %v3872_v11 = vld [vmem:[#allocation8 + $0xc8] sm:$0xff]  ;;  %v667_v28 = vadd.f32 %v4346_v25, %v3229_v21 }
 0x1c0   : > { %1960 = vmatpush.xpose.msrb.mxu2 %v1057_v31  ;;  %2025 = vmatpush.xpose.msrb.mxu3 %v1058_v62  ;;  %v1593_v31 = vmul.f32 %v3835_v37, %v1325_v60  ;;  %v1328_v62 = vadd.f32 %v3745_v14, %v3540_v15  ;;  %v3864_v60 = vld [vmem:[#allocation6 + $0xc0] sm:$0xff]  ;;  %v1722_v10 = vadd.f32 %v1658_v26, %v1594_v55  ;;  %v4347_v38 = vld [vmem:[#allocation74_spill] sm:$0xff] }
 0x1c1   : > { %2474 = vmatmul.msk.f32.gmra.mxu3 %vm486_vm0, %v1162_v59  ;;  %v780_v16 = vadd.f32 %v4347_v38, %v3231_v22  ;;  %v920_v59 = vmul.f32 %v4318_v17, %v783_v42  ;;  %v1331_v26 = vadd.f32 %v3786_v9, %v3540_v15  ;;  %v1444_v55 = vadd.f32 %v3788_v45, %v3542_v39  ;;  %v4349_v17 = vld [vmem:[#allocation64_spill] sm:$0xff] }
 0x1c2   : > { %v1721_v61 = vadd.f32 %v1657_v19, %v1593_v31  ;;  %v1595_v14 = vmul.f32 %v3864_v60, %v1328_v62  ;;  %v1660_v23 = vmul.f32 %v3872_v11, %v1328_v62 }
 0x1c3   : > { %1873 = vmatmul.f32.gmra.mxu0 %v1719_v1  ;;  %v1441_v1 = vadd.f32 %v3747_v7, %v3542_v39  ;;  %v981_v9 = vmul.f32 %v3422_v33, %v780_v16  ;;  %v4351_v33 = vld [vmem:[#allocation55_spill] sm:$0xff] }
 0x1c4   : > { %1961 = vmatpush.xpose.msrb.mxu2 %v1055_v56  ;;  %2026 = vmatpush.xpose.msrb.mxu3 %v1056_v30  ;;  %v3856_v52 = vpop.f32.mrf.mxu2  ;;  %v3858_v35 = vpop.f32.mrf.mxu3  ;;  %v919_v56 = vmul.f32 %v4315_v13, %v670_v43  ;;  %v983_v30 = vmul.f32 %v4316_v24, %v783_v42  ;;  %v3902_v24 = vld [vmem:[#allocation6 + $0xd0] sm:$0xff]  ;;  %v774_v25 = vadd.f32 %v4351_v33, %v3231_v22  ;;  %v4358_v33 = vld [vmem:[#allocation46_spill] sm:$0xff] }
 0x1c5   : > { %1938 = vmatmul.f32.gmra.mxu1 %v1720_v63  ;;  %v3874_v63 = vld [vmem:[#allocation6 + $0xc8] sm:$0xff]  ;;  %v1659_v7 = vmul.f32 %v3866_v49, %v1441_v1  ;;  %v1597_v42 = vmul.f32 %v3902_v24, %v1331_v26 }
 0x1c6   : > { %v1596_v32 = vmul.f32 %v3874_v63, %v1441_v1  ;;  %v1047_v45 = vadd.f32 %v983_v30, %v919_v56 }
 0x1c7   : > { %v1723_v19 = vadd.f32 %v1659_v7, %v1595_v14 }
 0x1c8   : > { %1962 = vmatpush.xpose.msrb.mxu2 %v1053_v44  ;;  %2027 = vmatpush.xpose.msrb.mxu3 %v1054_v54  ;;  %v4348_v44 = vld [vmem:[#allocation63_spill] sm:$0xff]  ;;  %v777_v54 = vadd.f32 %v4349_v17, %v3231_v22  ;;  %v1724_v62 = vadd.f32 %v1660_v23, %v1596_v32  ;;  %v4354_v17 = vld [vmem:[#allocation56_spill] sm:$0xff] }
 0x1c9   : > { %v664_v13 = vadd.f32 %v4348_v44, %v3229_v21 }
 0x1ca   : > { %v916_v32 = vmul.f32 %v3445_v48, %v777_v54  ;;  %v3940_v48 = vld [vmem:[#allocation8 + $0xe0] sm:$0xff] }
 0x1cb   : > { %1876 = vmatmul.f32.gmra.mxu0 %v1721_v61  ;;  %v917_v61 = vmul.f32 %v3420_v0, %v667_v28  ;;  %v4350_v0 = vld [vmem:[#allocation54_spill] sm:$0xff]  ;;  %v980_v56 = vmul.f32 %v3447_v4, %v664_v13  ;;  %v4353_v4 = vld [vmem:[#allocation52_spill] sm:$0xff] }
 0x1cc   : > { %1963 = vmatpush.xpose.msrb.mxu2 %v3650_v6  ;;  %2028 = vmatpush.xpose.msrb.mxu3 %v3652_v34  ;;  %v984_v6 = vmul.f32 %v4317_v27, %v670_v43  ;;  %v3890_v34 = vpop.f32.mrf.mxu2  ;;  %v3892_v31 = vpop.f32.mrf.mxu3  ;;  %v3904_v27 = vld [vmem:[#allocation8 + $0xd0] sm:$0xff]  ;;  %v3912_v43 = vld [vmem:[#allocation8 + $0xd8] sm:$0xff]  ;;  %v661_v7 = vadd.f32 %v4350_v0, %v3229_v21  ;;  %v771_v44 = vadd.f32 %v4353_v4, %v3231_v22 }
 0x1cd   : > { %1941 = vmatmul.f32.gmra.mxu1 %v1722_v10  ;;  %v918_v10 = vmul.f32 %v4314_v5, %v780_v16  ;;  %v1661_v14 = vmul.f32 %v3904_v27, %v1444_v55  ;;  %v915_v5 = vmul.f32 %v3439_v8, %v664_v13  ;;  %v1045_v16 = vadd.f32 %v981_v9, %v917_v61 }
 0x1ce   : > { %v1048_v1 = vadd.f32 %v984_v6, %v920_v59  ;;  %v1334_v8 = vadd.f32 %v3827_v29, %v3540_v15  ;;  %v913_v13 = vmul.f32 %v3465_v36, %v661_v7  ;;  %v1044_v9 = vadd.f32 %v980_v56, %v916_v32  ;;  %v4357_v36 = vld [vmem:[#allocation45_spill] sm:$0xff] }
 0x1cf   : > { %v1725_v6 = vadd.f32 %v1661_v14, %v1597_v42  ;;  %v655_v0 = vadd.f32 %v4357_v36, %v3229_v21  ;;  %v4361_v56 = vld [vmem:[#allocation61_spill] sm:$0xff] }
 0x1d0   : > { %1964 = vmatpush.xpose.msrb.mxu2 %v3627_v46  ;;  %2029 = vmatpush.xpose.msrb.mxu3 %v3629_v53  ;;  %v982_v46 = vmul.f32 %v3426_v2, %v667_v28  ;;  %v3914_v53 = vld [vmem:[#allocation6 + $0xd8] sm:$0xff]  ;;  %v979_v2 = vmul.f32 %v3441_v47, %v777_v54  ;;  %v1662_v28 = vmul.f32 %v3912_v43, %v1331_v26 }
 0x1d1   : > { %v1598_v38 = vmul.f32 %v3914_v53, %v1444_v55  ;;  %v1447_v47 = vadd.f32 %v3829_v50, %v3542_v39  ;;  %v3938_v55 = vld [vmem:[#allocation6 + $0xe0] sm:$0xff]  ;;  %v977_v54 = vmul.f32 %v4354_v17, %v774_v25 }
 0x1d2   : > { %v1046_v23 = vadd.f32 %v982_v46, %v918_v10  ;;  %v1043_v61 = vadd.f32 %v979_v2, %v915_v5  ;;  %v4355_v50 = vld [vmem:[#allocation57_spill] sm:$0xff]  ;;  %v3948_v10 = vld [vmem:[#allocation8 + $0xe8] sm:$0xff]  ;;  %v1599_v42 = vmul.f32 %v3938_v55, %v1334_v8  ;;  %v768_v5 = vadd.f32 %v4358_v33, %v3231_v22 }
 0x1d3   : > { %1879 = vmatmul.f32.gmra.mxu0 %v1723_v19  ;;  %v4352_v19 = vld [vmem:[#allocation51_spill] sm:$0xff]  ;;  %v1726_v29 = vadd.f32 %v1662_v28, %v1598_v38  ;;  %v3950_v46 = vld [vmem:[#allocation6 + $0xe8] sm:$0xff]  ;;  %v1663_v14 = vmul.f32 %v3940_v48, %v1447_v47  ;;  %v1664_v38 = vmul.f32 %v3948_v10, %v1334_v8 }
 0x1d4   : > { %1965 = vmatpush.xpose.msrb.mxu2 %v1047_v45  ;;  %2030 = vmatpush.xpose.msrb.mxu3 %v1048_v1  ;;  %v3928_v30 = vpop.f32.mrf.mxu2  ;;  %v3930_v59 = vpop.f32.mrf.mxu3  ;;  %v658_v26 = vadd.f32 %v4352_v19, %v3229_v21  ;;  %v4356_v45 = vld [vmem:[#allocation58_spill] sm:$0xff]  ;;  %v4363_v8 = vld [vmem:[#allocation39_spill] sm:$0xff] }
 0x1d5   : > { %1944 = vmatmul.f32.gmra.mxu1 %v1724_v62  ;;  %v914_v62 = vmul.f32 %v4355_v50, %v774_v25  ;;  %v978_v1 = vmul.f32 %v4356_v45, %v661_v7  ;;  %v4359_v25 = vld [vmem:[#allocation59_spill] sm:$0xff]  ;;  %v4360_v7 = vld [vmem:[#allocation60_spill] sm:$0xff]  ;;  %v4362_v19 = vld [vmem:[#allocation62_spill] sm:$0xff] }
 0x1d6   : > { %v911_v2 = vmul.f32 %v4359_v25, %v658_v26  ;;  %v975_v28 = vmul.f32 %v4360_v7, %v771_v44  ;;  %v976_v4 = vmul.f32 %v4362_v19, %v658_v26  ;;  %v4365_v26 = vld [vmem:[#allocation40_spill] sm:$0xff] }
 0x1d7   : > { %v1042_v32 = vadd.f32 %v978_v1, %v914_v62  ;;  %v4366_v62 = vld [vmem:[#allocation65_spill] sm:$0xff]  ;;  %v4367_v1 = vld [vmem:[#allocation66_spill] sm:$0xff]  ;;  %v4369_v25 = vld [vmem:[#allocation68_spill] sm:$0xff] }
 0x1d8   : > { %1966 = vmatpush.xpose.msrb.mxu2 %v1045_v16  ;;  %2031 = vmatpush.xpose.msrb.mxu3 %v1046_v23  ;;  %v1600_v16 = vmul.f32 %v3950_v46, %v1447_v47  ;;  %v1041_v23 = vadd.f32 %v977_v54, %v913_v13  ;;  %v652_v47 = vadd.f32 %v4363_v8, %v3229_v21  ;;  %v3974_v13 = vld [vmem:[#allocation6 + $0xf0] sm:$0xff]  ;;  %v4370_v8 = vld [vmem:[#allocation29_spill] sm:$0xff] }
 0x1d9   : > { %v765_v54 = vadd.f32 %v4365_v26, %v3231_v22  ;;  %v909_v45 = vmul.f32 %v4366_v62, %v655_v0  ;;  %v974_v7 = vmul.f32 %v4369_v25, %v655_v0  ;;  %v649_v26 = vadd.f32 %v4370_v8, %v3229_v21  ;;  %v4373_v0 = vld [vmem:[#allocation70_spill] sm:$0xff]  ;;  %v4375_v25 = vld [vmem:[#allocation72_spill] sm:$0xff] }
 0x1da   : > { %v972_v21 = vmul.f32 %v4375_v25, %v652_v47 }
 0x1db   : > { %1882 = vmatmul.f32.gmra.mxu0 %v1725_v6  ;;  %v912_v6 = vmul.f32 %v4361_v56, %v771_v44  ;;  %v3976_v44 = vld [vmem:[#allocation8 + $0xf0] sm:$0xff] }
 0x1dc   : > { %1967 = vmatpush.xpose.msrb.mxu2 %v1043_v61  ;;  %2032 = vmatpush.xpose.msrb.mxu3 %v1044_v9  ;;  %v3964_v17 = vpop.f32.mrf.mxu2  ;;  %v3966_v50 = vpop.f32.mrf.mxu3  ;;  %v1727_v61 = vadd.f32 %v1663_v14, %v1599_v42  ;;  %v1337_v9 = vadd.f32 %v3856_v52, %v3540_v15  ;;  %4364 = vst [vmem:[#allocation50_spill] sm:$0xff] %v3976_v44 }
 0x1dd   : > { %1947 = vmatmul.f32.gmra.mxu1 %v1726_v29  ;;  %v1450_v29 = vadd.f32 %v3858_v35, %v3542_v39  ;;  %v973_v42 = vmul.f32 %v4367_v1, %v768_v5  ;;  %v1728_v52 = vadd.f32 %v1664_v38, %v1600_v16  ;;  %v1039_v14 = vadd.f32 %v975_v28, %v911_v2  ;;  %v4368_v35 = vld [vmem:[#allocation67_spill] sm:$0xff]  ;;  %v4371_v38 = vld [vmem:[#allocation30_spill] sm:$0xff] }
 0x1de   : > { %v1040_v36 = vadd.f32 %v976_v4, %v912_v6  ;;  %v910_v33 = vmul.f32 %v4368_v35, %v768_v5  ;;  %v1601_v56 = vmul.f32 %v3974_v13, %v1337_v9  ;;  %v762_v2 = vadd.f32 %v4371_v38, %v3231_v22  ;;  %v4372_v5 = vld [vmem:[#allocation69_spill] sm:$0xff]  ;;  %v4374_v1 = vld [vmem:[#allocation71_spill] sm:$0xff] }
 0x1df   : > { %v1665_v19 = vmul.f32 %v3976_v44, %v1450_v29  ;;  %v907_v28 = vmul.f32 %v4372_v5, %v652_v47  ;;  %v971_v16 = vmul.f32 %v4373_v0, %v765_v54  ;;  %v908_v35 = vmul.f32 %v4374_v1, %v765_v54  ;;  %v4379_v44 = vld [vmem:[#allocation78_spill] sm:$0xff] }
 0x1e0   : > { %1968 = vmatpush.xpose.msrb.mxu2 %v1041_v23  ;;  %2033 = vmatpush.xpose.msrb.mxu3 %v1042_v32  ;;  %v3984_v23 = vld [vmem:[#allocation8 + $0xf8] sm:$0xff]  ;;  %v1038_v62 = vadd.f32 %v974_v7, %v910_v33  ;;  %v4378_v7 = vld [vmem:[#allocation77_spill] sm:$0xff] }
 0x1e1   : > { %v3986_v32 = vld [vmem:[#allocation6 + $0xf8] sm:$0xff]  ;;  %v1666_v6 = vmul.f32 %v3984_v23, %v1337_v9  ;;  %v4376_v9 = vld [vmem:[#allocation75_spill] sm:$0xff]  ;;  %v1035_v47 = vadd.f32 %v971_v16, %v907_v28  ;;  %v1036_v33 = vadd.f32 %v972_v21, %v908_v35  ;;  %v906_v38 = vmul.f32 %v4378_v7, %v762_v2 }
 0x1e2   : > { %v1602_v4 = vmul.f32 %v3986_v32, %v1450_v29  ;;  %v905_v29 = vmul.f32 %v4376_v9, %v649_v26 }
 0x1e3   : > { %1885 = vmatmul.f32.gmra.mxu0 %v1727_v61  ;;  %v1037_v61 = vadd.f32 %v973_v42, %v909_v45  ;;  %v4377_v45 = vld [vmem:[#allocation76_spill] sm:$0xff] }
 0x1e4   : > { %1969 = vmatpush.xpose.msrb.mxu2 %v1039_v14  ;;  %2034 = vmatpush.xpose.msrb.mxu3 %v1040_v36  ;;  %v4000_v8 = vpop.f32.mrf.mxu2  ;;  %v4002_v22 = vpop.f32.mrf.mxu3  ;;  %v1729_v14 = vadd.f32 %v1665_v19, %v1601_v56  ;;  %v1340_v36 = vadd.f32 %v3890_v34, %v3540_v15  ;;  %v969_v42 = vmul.f32 %v4377_v45, %v762_v2 }
 0x1e5   : > { %1950 = vmatmul.f32.gmra.mxu1 %v1728_v52  ;;  %v1453_v52 = vadd.f32 %v3892_v31, %v3542_v39  ;;  %v1730_v54 = vadd.f32 %v1666_v6, %v1602_v4  ;;  %v970_v56 = vmul.f32 %v4379_v44, %v649_v26  ;;  %v1343_v2 = vadd.f32 %v3928_v30, %v3540_v15 }
 0x1e6   : > { %v1603_v34 = vmul.f32 %v1340_v36, %v4376_v9  ;;  %v1668_v19 = vmul.f32 %v1340_v36, %v4379_v44  ;;  %v1456_v44 = vadd.f32 %v3930_v59, %v3542_v39  ;;  %v1346_v59 = vadd.f32 %v3964_v17, %v3540_v15  ;;  %v2584_v17 = vld [vmem:[#allocation8 + $0x20] sm:$0xff] }
 0x1e7   : > { %v1604_v31 = vmul.f32 %v1453_v52, %v4378_v7  ;;  %v1034_v6 = vadd.f32 %v970_v56, %v906_v38  ;;  %v1605_v36 = vmul.f32 %v1343_v2, %v4372_v5  ;;  %v1459_v5 = vadd.f32 %v3966_v50, %v3542_v39  ;;  %v2582_v7 = vld [vmem:[#allocation8 + $0x28] sm:$0xff] }
 0x1e8   : > { %1970 = vmatpush.xpose.msrb.mxu2 %v1037_v61  ;;  %2035 = vmatpush.xpose.msrb.mxu3 %v1038_v62  ;;  %v1667_v61 = vmul.f32 %v1453_v52, %v4377_v45  ;;  %v1033_v62 = vadd.f32 %v969_v42, %v905_v29  ;;  %v1670_v52 = vmul.f32 %v1343_v2, %v4375_v25  ;;  %v2583_v56 = vld [vmem:[#allocation6 + $0x28] sm:$0xff] }
 0x1e9   : > { %v1732_v4 = vadd.f32 %v1668_v19, %v1604_v31  ;;  %v1606_v30 = vmul.f32 %v1456_v44, %v4374_v1  ;;  %v1669_v9 = vmul.f32 %v1456_v44, %v4373_v0  ;;  %v1672_v38 = vmul.f32 %v2582_v7, %v1346_v59  ;;  %v2585_v44 = vld [vmem:[#allocation6 + $0x30] sm:$0xff] }
 0x1ea   : > { %v1731_v16 = vadd.f32 %v1667_v61, %v1603_v34  ;;  %v1608_v34 = vmul.f32 %v2583_v56, %v1459_v5  ;;  %v1671_v19 = vmul.f32 %v2584_v17, %v1459_v5  ;;  %v1349_v50 = vadd.f32 %v4000_v8, %v3540_v15  ;;  %v2588_v8 = vld [vmem:[#allocation8 + $0x30] sm:$0xff] }
 0x1eb   : > { %1888 = vmatmul.f32.gmra.mxu0 %v1729_v14  ;;  %v1733_v29 = vadd.f32 %v1669_v9, %v1605_v36  ;;  %v1734_v45 = vadd.f32 %v1670_v52, %v1606_v30  ;;  %v2587_v52 = vld [vmem:[#allocation6 + $0x38] sm:$0xff] }
 0x1ec   : > { %1971 = vmatpush.xpose.msrb.mxu2 %v1035_v47  ;;  %2036 = vmatpush.xpose.msrb.mxu3 %v1036_v33  ;;  %v1351_v28 = vpop.f32.mrf.mxu2  ;;  %v1464_v26 = vpop.f32.mrf.mxu3  ;;  %v2581_v33 = vld [vmem:[#allocation6 + $0x20] sm:$0xff]  ;;  %v1736_v61 = vadd.f32 %v1672_v38, %v1608_v34  ;;  %v2591_v38 = vld [vmem:[#allocation6 + $0x48] sm:$0xff] }
 0x1ed   : > { %1953 = vmatmul.f32.gmra.mxu1 %v1730_v54  ;;  %v1607_v0 = vmul.f32 %v2581_v33, %v1346_v59  ;;  %v1352_v59 = vadd.f32 %v1351_v28, %v3540_v15  ;;  %v2592_v34 = vld [vmem:[#allocation8 + $0x40] sm:$0xff] }
 0x1ef   : > { %v1735_v31 = vadd.f32 %v1671_v19, %v1607_v0  ;;  %v2590_v0 = vld [vmem:[#allocation8 + $0x48] sm:$0xff] }
 0x1f0   : > { %1972 = vmatpush.xpose.msrb.mxu2 %v1033_v62  ;;  %2037 = vmatpush.xpose.msrb.mxu3 %v1034_v6  ;;  %v1844_v35 = vpop.f32.mrf.mxu0  ;;  %v1462_v62 = vadd.f32 %v4002_v22, %v3542_v39  ;;  %v1676_v7 = vmul.f32 %v2590_v0, %v1352_v59 }
 0x1f1   : > { %v1909_v21 = vpop.f32.mrf.mxu1 }
 0x1f2   : > { %v1910_v14 = vadd.f32 %v1909_v21, %v1844_v35  ;;  %v1609_v35 = vmul.f32 %v2585_v44, %v1349_v50  ;;  %v1610_v30 = vmul.f32 %v2587_v52, %v1462_v62  ;;  %v1673_v9 = vmul.f32 %v2588_v8, %v1462_v62 }
 0x1f3   : > { %1973 = vmatmul.f32.vlgmr.msrb.gmra.mxu2 %v1731_v16  ;;  %2038 = vmatmul.f32.vlgmr.msrb.gmra.mxu3 %v1732_v4 }
 0x1f4   : > { %2087 = vst [vmem:[%s4025_s21] sm:$0xff] %v1910_v14  ;;  %v1354_v42 = vpop.f32.mrf.mxu2  ;;  %v1467_v25 = vpop.f32.mrf.mxu3  ;;  %v2586_v14 = vld [vmem:[#allocation8 + $0x38] sm:$0xff]  ;;  %v1737_v22 = vadd.f32 %v1673_v9, %v1609_v35 }
 0x1f5   : > { %v1674_v36 = vmul.f32 %v2586_v14, %v1349_v50  ;;  %v1355_v50 = vadd.f32 %v1354_v42, %v3540_v15  ;;  %v2594_v35 = vld [vmem:[#allocation8 + $0x58] sm:$0xff] }
 0x1f7   : > { %v1678_v14 = vmul.f32 %v2594_v35, %v1355_v50 }
 0x1f8   : > { %v1847_v54 = vpop.f32.mrf.mxu0 }
 0x1f9   : > { %v1912_v47 = vpop.f32.mrf.mxu1 }
 0x1fa   : > { %v1913_v1 = vadd.f32 %v1912_v47, %v1847_v54 }
 0x1fb   : > { %1976 = vmatmul.f32.gmra.mxu2 %v1733_v29  ;;  %2041 = vmatmul.f32.gmra.mxu3 %v1734_v45  ;;  %v1738_v29 = vadd.f32 %v1674_v36, %v1610_v30  ;;  %v1465_v45 = vadd.f32 %v1464_v26, %v3542_v39  ;;  %v2595_v36 = vld [vmem:[#allocation6 + $0x58] sm:$0xff]  ;;  %v2596_v30 = vld [vmem:[#allocation8 + $0x50] sm:$0xff] }
 0x1fc   : > { %2088 = vst [vmem:[%s4025_s21 + $0x8] sm:$0xff] %v1913_v1  ;;  %v1357_v16 = vpop.f32.mrf.mxu2  ;;  %v1470_v21 = vpop.f32.mrf.mxu3  ;;  %v2589_v1 = vld [vmem:[#allocation6 + $0x40] sm:$0xff] }
 0x1fd   : > { %v1611_v33 = vmul.f32 %v2589_v1, %v1352_v59  ;;  %v1612_v56 = vmul.f32 %v2591_v38, %v1465_v45  ;;  %v1675_v17 = vmul.f32 %v2592_v34, %v1465_v45  ;;  %v1358_v9 = vadd.f32 %v1357_v16, %v3540_v15 }
 0x1ff   : > { %v1740_v26 = vadd.f32 %v1676_v7, %v1612_v56  ;;  %v2599_v7 = vld [vmem:[#allocation6 + $0x68] sm:$0xff]  ;;  %v2600_v56 = vld [vmem:[#allocation8 + $0x60] sm:$0xff] }
 0x200   : > { %v1850_v6 = vpop.f32.mrf.mxu0 }
 0x201   : > { %v1915_v2 = vpop.f32.mrf.mxu1 }
 0x202   : > { %v1916_v4 = vadd.f32 %v1915_v2, %v1850_v6 }
 0x203   : > { %1979 = vmatmul.f32.gmra.mxu2 %v1735_v31  ;;  %2044 = vmatmul.f32.gmra.mxu3 %v1736_v61  ;;  %v1739_v31 = vadd.f32 %v1675_v17, %v1611_v33  ;;  %v1468_v61 = vadd.f32 %v1467_v25, %v3542_v39  ;;  %v2598_v33 = vld [vmem:[#allocation8 + $0x68] sm:$0xff] }
 0x204   : > { %2089 = vst [vmem:[%s4025_s21 + $0x10] sm:$0xff] %v1916_v4  ;;  %v1360_v19 = vpop.f32.mrf.mxu2  ;;  %v1473_v28 = vpop.f32.mrf.mxu3  ;;  %v2593_v4 = vld [vmem:[#allocation6 + $0x50] sm:$0xff]  ;;  %v1680_v0 = vmul.f32 %v2598_v33, %v1358_v9 }
 0x205   : > { %v1613_v44 = vmul.f32 %v2593_v4, %v1355_v50  ;;  %v1614_v52 = vmul.f32 %v2595_v36, %v1468_v61  ;;  %v1677_v8 = vmul.f32 %v2596_v30, %v1468_v61  ;;  %v1361_v16 = vadd.f32 %v1360_v19, %v3540_v15 }
 0x207   : > { %v1742_v25 = vadd.f32 %v1678_v14, %v1614_v52  ;;  %v2603_v14 = vld [vmem:[#allocation6 + $0x78] sm:$0xff]  ;;  %v2604_v52 = vld [vmem:[#allocation8 + $0x70] sm:$0xff] }
 0x208   : > { %v1853_v5 = vpop.f32.mrf.mxu0 }
 0x209   : > { %v1918_v54 = vpop.f32.mrf.mxu1 }
 0x20a   : > { %v1919_v47 = vadd.f32 %v1918_v54, %v1853_v5 }
 0x20b   : > { %1982 = vmatmul.f32.gmra.mxu2 %v1737_v22  ;;  %2047 = vmatmul.f32.gmra.mxu3 %v1738_v29  ;;  %v1741_v22 = vadd.f32 %v1677_v8, %v1613_v44  ;;  %v1471_v29 = vadd.f32 %v1470_v21, %v3542_v39  ;;  %v1474_v21 = vadd.f32 %v1473_v28, %v3542_v39  ;;  %v2602_v44 = vld [vmem:[#allocation8 + $0x78] sm:$0xff] }
 0x20c   : > { %2090 = vst [vmem:[%s4025_s21 + $0x18] sm:$0xff] %v1919_v47  ;;  %v1363_v42 = vpop.f32.mrf.mxu2  ;;  %v1476_v59 = vpop.f32.mrf.mxu3  ;;  %v2597_v47 = vld [vmem:[#allocation6 + $0x60] sm:$0xff]  ;;  %v1682_v35 = vmul.f32 %v2602_v44, %v1361_v16 }
 0x20d   : > { %v1615_v1 = vmul.f32 %v2597_v47, %v1358_v9  ;;  %v1616_v38 = vmul.f32 %v2599_v7, %v1471_v29  ;;  %v1679_v34 = vmul.f32 %v2600_v56, %v1471_v29  ;;  %v1618_v36 = vmul.f32 %v2603_v14, %v1474_v21 }
 0x20e   : > { %v1681_v19 = vmul.f32 %v2604_v52, %v1474_v21  ;;  %v1364_v30 = vadd.f32 %v1363_v42, %v3540_v15  ;;  %v1477_v9 = vadd.f32 %v1476_v59, %v3542_v39  ;;  %v4381_v21 = vld [vmem:[#allocation47_spill] sm:$0xff] }
 0x20f   : > { %v1743_v17 = vadd.f32 %v1679_v34, %v1615_v1  ;;  %v1744_v50 = vadd.f32 %v1680_v0, %v1616_v38  ;;  %v1746_v8 = vadd.f32 %v1682_v35, %v1618_v36  ;;  %v2606_v1 = vld [vmem:[#allocation8 + $0x88] sm:$0xff]  ;;  %v4380_v38 = vld [vmem:[#allocation53_spill] sm:$0xff] }
 0x210   : > { %v1856_v62 = vpop.f32.mrf.mxu0  ;;  %v1684_v33 = vmul.f32 %v2606_v1, %v1364_v30  ;;  %v2607_v0 = vld [vmem:[#allocation6 + $0x88] sm:$0xff]  ;;  %v1683_v42 = vmul.f32 %v4380_v38, %v1477_v9 }
 0x211   : > { %v1921_v6 = vpop.f32.mrf.mxu1  ;;  %v1620_v7 = vmul.f32 %v2607_v0, %v1477_v9 }
 0x212   : > { %v1922_v2 = vadd.f32 %v1921_v6, %v1856_v62 }
 0x213   : > { %1985 = vmatmul.f32.gmra.mxu2 %v1739_v31  ;;  %2050 = vmatmul.f32.gmra.mxu3 %v1740_v26  ;;  %v1748_v34 = vadd.f32 %v1684_v33, %v1620_v7 }
 0x214   : > { %2091 = vst [vmem:[%s4025_s21 + $0x20] sm:$0xff] %v1922_v2  ;;  %v1366_v31 = vpop.f32.mrf.mxu2  ;;  %v1479_v61 = vpop.f32.mrf.mxu3  ;;  %v2601_v2 = vld [vmem:[#allocation6 + $0x70] sm:$0xff] }
 0x215   : > { %v1617_v4 = vmul.f32 %v2601_v2, %v1361_v16  ;;  %v1367_v56 = vadd.f32 %v1366_v31, %v3540_v15  ;;  %v1480_v16 = vadd.f32 %v1479_v61, %v3542_v39 }
 0x217   : > { %v1745_v28 = vadd.f32 %v1681_v19, %v1617_v4  ;;  %v1622_v2 = vmul.f32 %v3767_v57, %v1480_v16  ;;  %v4382_v4 = vld [vmem:[#allocation48_spill] sm:$0xff] }
 0x218   : > { %v1859_v45 = vpop.f32.mrf.mxu0  ;;  %v1685_v44 = vmul.f32 %v4382_v4, %v1480_v16 }
 0x219   : > { %v1924_v5 = vpop.f32.mrf.mxu1 }
 0x21a   : > { %v1925_v54 = vadd.f32 %v1924_v5, %v1859_v45  ;;  %v2605_v5 = vld [vmem:[#allocation6 + $0x80] sm:$0xff] }
 0x21b   : > { %1988 = vmatmul.f32.gmra.mxu2 %v1741_v22  ;;  %2053 = vmatmul.f32.gmra.mxu3 %v1742_v25 }
 0x21c   : > { %2092 = vst [vmem:[%s4025_s21 + $0x28] sm:$0xff] %v1925_v54  ;;  %v1369_v29 = vpop.f32.mrf.mxu2  ;;  %v1619_v54 = vmul.f32 %v2605_v5, %v1364_v30  ;;  %v1482_v47 = vpop.f32.mrf.mxu3 }
 0x21d   : > { %v1370_v14 = vadd.f32 %v1369_v29, %v3540_v15  ;;  %v1483_v52 = vadd.f32 %v1482_v47, %v3542_v39 }
 0x21e   : > { %v1747_v59 = vadd.f32 %v1683_v42, %v1619_v54 }
 0x21f   : > { %v1624_v57 = vmul.f32 %v3808_v20, %v1483_v52  ;;  %v1687_v9 = vmul.f32 %v3798_v3, %v1483_v52 }
 0x220   : > { %v1862_v26 = vpop.f32.mrf.mxu0 }
 0x221   : > { %v1927_v62 = vpop.f32.mrf.mxu1 }
 0x222   : > { %v1928_v6 = vadd.f32 %v1927_v62, %v1862_v26  ;;  %v1621_v26 = vmul.f32 %v4381_v21, %v1367_v56  ;;  %v1686_v62 = vmul.f32 %v3763_v58, %v1367_v56  ;;  %v1623_v58 = vmul.f32 %v3796_v40, %v1370_v14 }
 0x223   : > { %1991 = vmatmul.f32.gmra.mxu2 %v1743_v17  ;;  %2056 = vmatmul.f32.gmra.mxu3 %v1744_v50 }
 0x224   : > { %2093 = vst [vmem:[%s4025_s21 + $0x30] sm:$0xff] %v1928_v6  ;;  %v1372_v35 = vpop.f32.mrf.mxu2  ;;  %v1485_v31 = vpop.f32.mrf.mxu3  ;;  %v1749_v61 = vadd.f32 %v1685_v44, %v1621_v26  ;;  %v1750_v36 = vadd.f32 %v1686_v62, %v1622_v2 }
 0x225   : > { %v1486_v54 = vadd.f32 %v1485_v31, %v3542_v39 }
 0x227   : > { %v1626_v3 = vmul.f32 %v3845_v51, %v1486_v54  ;;  %v1689_v20 = vmul.f32 %v3837_v12, %v1486_v54 }
 0x228   : > { %v1865_v22 = vpop.f32.mrf.mxu0 }
 0x229   : > { %v1930_v25 = vpop.f32.mrf.mxu1 }
 0x22a   : > { %v1931_v45 = vadd.f32 %v1930_v25, %v1865_v22  ;;  %v1373_v25 = vadd.f32 %v1372_v35, %v3540_v15 }
 0x22b   : > { %1994 = vmatmul.f32.gmra.mxu2 %v1745_v28  ;;  %2059 = vmatmul.f32.gmra.mxu3 %v1746_v8  ;;  %v1688_v28 = vmul.f32 %v3806_v41, %v1370_v14 }
 0x22c   : > { %2094 = vst [vmem:[%s4025_s21 + $0x38] sm:$0xff] %v1931_v45  ;;  %v1375_v22 = vpop.f32.mrf.mxu2  ;;  %v1488_v29 = vpop.f32.mrf.mxu3  ;;  %v1751_v45 = vadd.f32 %v1687_v9, %v1623_v58  ;;  %v1625_v41 = vmul.f32 %v3835_v37, %v1373_v25  ;;  %v1690_v1 = vmul.f32 %v3843_v18, %v1373_v25 }
 0x22d   : > { %v1752_v5 = vadd.f32 %v1688_v28, %v1624_v57  ;;  %v1376_v0 = vadd.f32 %v1375_v22, %v3540_v15  ;;  %v1489_v42 = vadd.f32 %v1488_v29, %v3542_v39 }
 0x22e   : > { %v1753_v7 = vadd.f32 %v1689_v20, %v1625_v41  ;;  %v1754_v38 = vadd.f32 %v1690_v1, %v1626_v3 }
 0x22f   : > { %v1627_v18 = vmul.f32 %v3864_v60, %v1376_v0  ;;  %v1692_v16 = vmul.f32 %v3872_v11, %v1376_v0  ;;  %v1628_v12 = vmul.f32 %v3874_v63, %v1489_v42  ;;  %v1691_v51 = vmul.f32 %v3866_v49, %v1489_v42 }
 0x230   : > { %v1868_v17 = vpop.f32.mrf.mxu0 }
 0x231   : > { %v1755_v21 = vadd.f32 %v1691_v51, %v1627_v18  ;;  %v1756_v26 = vadd.f32 %v1692_v16, %v1628_v12 }
 0x232   : > { %v1933_v50 = vpop.f32.mrf.mxu1 }
 0x233   : > { %v1934_v6 = vadd.f32 %v1933_v50, %v1868_v17  ;;  %1997 = vmatmul.f32.gmra.mxu2 %v1747_v59  ;;  %2062 = vmatmul.f32.gmra.mxu3 %v1748_v34 }
 0x234   : > { %v1378_v56 = vpop.f32.mrf.mxu2  ;;  %v1491_v37 = vpop.f32.mrf.mxu3 }
 0x235   : > { %2095 = vst [vmem:[%s4025_s21 + $0x40] sm:$0xff] %v1934_v6  ;;  %v1379_v50 = vadd.f32 %v1378_v56, %v3540_v15  ;;  %v1492_v62 = vadd.f32 %v1491_v37, %v3542_v39 }
 0x237   : > { %v1629_v11 = vmul.f32 %v3902_v24, %v1379_v50  ;;  %v1694_v4 = vmul.f32 %v3912_v43, %v1379_v50  ;;  %v1630_v49 = vmul.f32 %v3914_v53, %v1492_v62  ;;  %v1693_v63 = vmul.f32 %v3904_v27, %v1492_v62 }
 0x238   : > { %v1871_v19 = vpop.f32.mrf.mxu0 }
 0x239   : > { %v1757_v14 = vadd.f32 %v1693_v63, %v1629_v11 }
 0x23a   : > { %v1936_v30 = vpop.f32.mrf.mxu1 }
 0x23b   : > { %v1937_v8 = vadd.f32 %v1936_v30, %v1871_v19  ;;  %2000 = vmatmul.f32.gmra.mxu2 %v1749_v61  ;;  %2065 = vmatmul.f32.gmra.mxu3 %v1750_v36  ;;  %v1758_v61 = vadd.f32 %v1694_v4, %v1630_v49 }
 0x23c   : > { %v1381_v2 = vpop.f32.mrf.mxu2  ;;  %v1494_v44 = vpop.f32.mrf.mxu3 }
 0x23d   : > { %2096 = vst [vmem:[%s4025_s21 + $0x48] sm:$0xff] %v1937_v8  ;;  %v1382_v31 = vadd.f32 %v1381_v2, %v3540_v15  ;;  %v1495_v36 = vadd.f32 %v1494_v44, %v3542_v39 }
 0x23f   : > { %v1631_v43 = vmul.f32 %v3938_v55, %v1382_v31  ;;  %v1696_v19 = vmul.f32 %v3948_v10, %v1382_v31  ;;  %v1632_v53 = vmul.f32 %v3950_v46, %v1495_v36  ;;  %v1695_v27 = vmul.f32 %v3940_v48, %v1495_v36 }
 0x240   : > { %v1874_v40 = vpop.f32.mrf.mxu0 }
 0x241   : > { %v1759_v57 = vadd.f32 %v1695_v27, %v1631_v43  ;;  %v1760_v9 = vadd.f32 %v1696_v19, %v1632_v53 }
 0x242   : > { %v1939_v47 = vpop.f32.mrf.mxu1 }
 0x243   : > { %v1940_v33 = vadd.f32 %v1939_v47, %v1874_v40  ;;  %2003 = vmatmul.f32.gmra.mxu2 %v1751_v45  ;;  %2068 = vmatmul.f32.gmra.mxu3 %v1752_v5  ;;  %v4383_v45 = vld [vmem:[#allocation50_spill] sm:$0xff] }
 0x244   : > { %v1384_v58 = vpop.f32.mrf.mxu2  ;;  %v1497_v28 = vpop.f32.mrf.mxu3 }
 0x245   : > { %2097 = vst [vmem:[%s4025_s21 + $0x50] sm:$0xff] %v1940_v33  ;;  %v1385_v8 = vadd.f32 %v1384_v58, %v3540_v15  ;;  %v1498_v22 = vadd.f32 %v1497_v28, %v3542_v39 }
 0x247   : > { %v1633_v10 = vmul.f32 %v3974_v13, %v1385_v8  ;;  %v1698_v29 = vmul.f32 %v3984_v23, %v1385_v8  ;;  %v1634_v48 = vmul.f32 %v3986_v32, %v1498_v22  ;;  %v1697_v5 = vmul.f32 %v4383_v45, %v1498_v22 }
 0x248   : > { %v1877_v59 = vpop.f32.mrf.mxu0 }
 0x249   : > { %v1761_v15 = vadd.f32 %v1697_v5, %v1633_v10  ;;  %v1762_v54 = vadd.f32 %v1698_v29, %v1634_v48 }
 0x24a   : > { %v1942_v34 = vpop.f32.mrf.mxu1 }
 0x24b   : > { %v1943_v17 = vadd.f32 %v1942_v34, %v1877_v59  ;;  %2006 = vmatmul.f32.gmra.mxu2 %v1753_v7  ;;  %2071 = vmatmul.f32.gmra.mxu3 %v1754_v38 }
 0x24d   : > { %2098 = vst [vmem:[%s4025_s21 + $0x58] sm:$0xff] %v1943_v17 }
 0x250   : > { %v1880_v6 = vpop.f32.mrf.mxu0 }
 0x252   : > { %v1945_v60 = vpop.f32.mrf.mxu1 }
 0x253   : > { %v1946_v35 = vadd.f32 %v1945_v60, %v1880_v6  ;;  %2009 = vmatmul.f32.gmra.mxu2 %v1755_v21  ;;  %2074 = vmatmul.f32.gmra.mxu3 %v1756_v26 }
 0x255   : > { %2099 = vst [vmem:[%s4025_s21 + $0x60] sm:$0xff] %v1946_v35 }
 0x258   : > { %v1883_v52 = vpop.f32.mrf.mxu0 }
 0x25a   : > { %v1948_v24 = vpop.f32.mrf.mxu1 }
 0x25b   : > { %v1949_v30 = vadd.f32 %v1948_v24, %v1883_v52  ;;  %2012 = vmatmul.f32.gmra.mxu2 %v1757_v14  ;;  %2077 = vmatmul.f32.gmra.mxu3 %v1758_v61 }
 0x25d   : > { %2100 = vst [vmem:[%s4025_s21 + $0x68] sm:$0xff] %v1949_v30 }
 0x260   : > { %v1886_v55 = vpop.f32.mrf.mxu0 }
 0x262   : > { %v1951_v25 = vpop.f32.mrf.mxu1 }
 0x263   : > { %v1952_v46 = vadd.f32 %v1951_v25, %v1886_v55  ;;  %2015 = vmatmul.f32.gmra.mxu2 %v1759_v57  ;;  %2080 = vmatmul.f32.gmra.mxu3 %v1760_v9 }
 0x265   : > { %2101 = vst [vmem:[%s4025_s21 + $0x70] sm:$0xff] %v1952_v46 }
 0x268   : > { %v1889_v39 = vpop.f32.mrf.mxu0 }
 0x26a   : > { %v1954_v40 = vpop.f32.mrf.mxu1 }
 0x26b   : > { %v1955_v47 = vadd.f32 %v1954_v40, %v1889_v39  ;;  %2018 = vmatmul.f32.gmra.mxu2 %v1761_v15  ;;  %2083 = vmatmul.f32.gmra.mxu3 %v1762_v54 }
 0x26d   : > { %2102 = vst [vmem:[%s4025_s21 + $0x78] sm:$0xff] %v1955_v47 }
 0x276   : > { %v1974_v13 = vpop.f32.mrf.mxu2  ;;  %v2039_v23 = vpop.f32.mrf.mxu3 }
 0x277   : > { %v2040_v41 = vadd.f32 %v2039_v23, %v1974_v13 }
 0x279   : > { %2103 = vst [vmem:[%s4025_s21 + $0x80] sm:$0xff] %v2040_v41 }
 0x27e   : > { %v1977_v32 = vpop.f32.mrf.mxu2  ;;  %v2042_v1 = vpop.f32.mrf.mxu3 }
 0x27f   : > { %v2043_v33 = vadd.f32 %v2042_v1, %v1977_v32 }
 0x281   : > { %2104 = vst [vmem:[%s4025_s21 + $0x88] sm:$0xff] %v2043_v33 }
 0x286   : > { %v1980_v3 = vpop.f32.mrf.mxu2  ;;  %v2045_v20 = vpop.f32.mrf.mxu3 }
 0x287   : > { %v2046_v0 = vadd.f32 %v2045_v20, %v1980_v3 }
 0x289   : > { %2105 = vst [vmem:[%s4025_s21 + $0x90] sm:$0xff] %v2046_v0 }
 0x28e   : > { %v1983_v7 = vpop.f32.mrf.mxu2  ;;  %v2048_v38 = vpop.f32.mrf.mxu3 }
 0x28f   : > { %v2049_v42 = vadd.f32 %v2048_v38, %v1983_v7 }
 0x291   : > { %2106 = vst [vmem:[%s4025_s21 + $0x98] sm:$0xff] %v2049_v42 }
 0x296   : > { %v1986_v56 = vpop.f32.mrf.mxu2  ;;  %v2051_v59 = vpop.f32.mrf.mxu3 }
 0x297   : > { %v2052_v37 = vadd.f32 %v2051_v59, %v1986_v56 }
 0x299   : > { %2107 = vst [vmem:[%s4025_s21 + $0xa0] sm:$0xff] %v2052_v37 }
 0x29e   : > { %v1989_v34 = vpop.f32.mrf.mxu2  ;;  %v2054_v18 = vpop.f32.mrf.mxu3 }
 0x29f   : > { %v2055_v16 = vadd.f32 %v2054_v18, %v1989_v34 }
 0x2a1   : > { %2108 = vst [vmem:[%s4025_s21 + $0xa8] sm:$0xff] %v2055_v16 }
 0x2a6   : > { %v1992_v17 = vpop.f32.mrf.mxu2  ;;  %v2057_v12 = vpop.f32.mrf.mxu3 }
 0x2a7   : > { %v2058_v51 = vadd.f32 %v2057_v12, %v1992_v17 }
 0x2a9   : > { %2109 = vst [vmem:[%s4025_s21 + $0xb0] sm:$0xff] %v2058_v51 }
 0x2ae   : > { %v1995_v50 = vpop.f32.mrf.mxu2  ;;  %v2060_v21 = vpop.f32.mrf.mxu3 }
 0x2af   : > { %v2061_v26 = vadd.f32 %v2060_v21, %v1995_v50 }
 0x2b1   : > { %2110 = vst [vmem:[%s4025_s21 + $0xb8] sm:$0xff] %v2061_v26 }
 0x2b6   : > { %v1998_v62 = vpop.f32.mrf.mxu2  ;;  %v2063_v6 = vpop.f32.mrf.mxu3 }
 0x2b7   : > { %v2064_v2 = vadd.f32 %v2063_v6, %v1998_v62 }
 0x2b9   : > { %2111 = vst [vmem:[%s4025_s21 + $0xc0] sm:$0xff] %v2064_v2 }
 0x2be   : > { %v2001_v60 = vpop.f32.mrf.mxu2  ;;  %v2066_v11 = vpop.f32.mrf.mxu3 }
 0x2bf   : > { %v2067_v4 = vadd.f32 %v2066_v11, %v2001_v60 }
 0x2c1   : > { %2112 = vst [vmem:[%s4025_s21 + $0xc8] sm:$0xff] %v2067_v4 }
 0x2c6   : > { %v2004_v44 = vpop.f32.mrf.mxu2  ;;  %v2069_v35 = vpop.f32.mrf.mxu3 }
 0x2c7   : > { %v2070_v49 = vadd.f32 %v2069_v35, %v2004_v44 }
 0x2c9   : > { %2113 = vst [vmem:[%s4025_s21 + $0xd0] sm:$0xff] %v2070_v49 }
 0x2ce   : > { %v2007_v63 = vpop.f32.mrf.mxu2  ;;  %v2072_v31 = vpop.f32.mrf.mxu3 }
 0x2cf   : > { %v2073_v14 = vadd.f32 %v2072_v31, %v2007_v63 }
 0x2d1   : > { %2114 = vst [vmem:[%s4025_s21 + $0xd8] sm:$0xff] %v2073_v14 }
 0x2d6   : > { %v2010_v61 = vpop.f32.mrf.mxu2  ;;  %v2075_v36 = vpop.f32.mrf.mxu3 }
 0x2d7   : > { %v2076_v52 = vadd.f32 %v2075_v36, %v2010_v61 }
 0x2d9   : > { %2115 = vst [vmem:[%s4025_s21 + $0xe0] sm:$0xff] %v2076_v52 }
 0x2de   : > { %v2013_v24 = vpop.f32.mrf.mxu2  ;;  %v2078_v43 = vpop.f32.mrf.mxu3 }
 0x2df   : > { %v2079_v19 = vadd.f32 %v2078_v43, %v2013_v24 }
 0x2e1   : > { %2116 = vst [vmem:[%s4025_s21 + $0xe8] sm:$0xff] %v2079_v19 }
 0x2e6   : > { %v2016_v30 = vpop.f32.mrf.mxu2  ;;  %v2081_v53 = vpop.f32.mrf.mxu3 }
 0x2e7   : > { %v2082_v27 = vadd.f32 %v2081_v53, %v2016_v30 }
 0x2e9   : > { %2117 = vst [vmem:[%s4025_s21 + $0xf0] sm:$0xff] %v2082_v27 }
 0x2ee   : > { %v2019_v58 = vpop.f32.mrf.mxu2  ;;  %v2084_v28 = vpop.f32.mrf.mxu3 }
 0x2ef   : > { %v2085_v8 = vadd.f32 %v2084_v28, %v2019_v58 }
 0x2f1   : > { %2118 = vst [vmem:[%s4025_s21 + $0xf8] sm:$0xff] %v2085_v8 }
 0x2f2   : > { %s2482_s17 = sshll.u32 %s2748_s27, 7  ;;  %s2147_s30 = sshll.u32 %s4025_s21, 4  ;;  %s2148_s30 = int_to_ptr.vmem [resolvable:$true] %s2147_s30 }
 0x2f3   : > { %s2136_s18 = scalar_lea.hbm %s4169_s7, %s2482_s17  ;;  %s2762_s8 = smov 2048  }
 0x2f4   : > { %s2149_s23 = sshll.u32 %s2136_s18, 4  ;;  %2493 = sst [smem:[#allocation11]] (%p2890_p0), %s2762_s8  ;;  %s2150_s23 = int_to_ptr.hbm [resolvable:$true] %s2149_s23 }
 0x2f5   : > { %s2763_s13 = smov 8192   ;;  %s2764_s16 = smov 16  }
 0x2f6   : > { %2494 = sst [smem:[#allocation11 + $0x1]] (%p2890_p0), %s2763_s13  ;;  %s2765_s27 = smov 128  }
 0x2f7   : > { %2495 = sst [smem:[#allocation11 + $0x2]] (%p2890_p0), %s2764_s16  ;;  %s2766_s22 = smov 8  }
 0x2f8   : > { %2496 = sst [smem:[#allocation11 + $0x3]] (%p2890_p0), %s2765_s27  ;;  %s2767_s5 = smov [#allocation10]  }
 0x2f9   : > { %2497 = sst [smem:[#allocation11 + $0x4]] (%p2890_p0), %s2765_s27  ;;  %s2768_s6 = smov 0  }
 0x2fa   : > { %2498 = sst [smem:[#allocation11 + $0x5]] (%p2890_p0), %s2766_s22 }
 0x2fb   : > { %2499 = dma.general (%p2890_p0), %s2148_s30, 4096, %s2150_s23, %s2120_s12, %s2767_s5, [#allocation11], %s2768_s6, 0  }
 0x2fc PF: > { %p2521_p3 = scmp.ge.s32.totalorder %s2756_s29, 2  ;;  %s2177_s11 = sand.u32 1, %s2736_s24  }
 0x2fd   : > { %s2178_s15 = scalar_lea.sflag [#allocation5], %s2177_s11 }
 0x2fe   : > { %p2513_p7 = pnand %p2521_p3, %p2856_p5 }
 0x300   : > { %p2514_p9 = pneg %p2513_p7 }
 0x302   : > { %2731 = dma.done.wait (%p2514_p9), %s2178_s15, 4096  }
 0x303   : > { %2733 = vsyncadd (%p2514_p9), %s2178_s15, 4294963200  ;;  %s24_s29 = sadd.s32 1, %s2756_s29   ;;  %s4385_s14 = sld [smem:[#allocation16_spill]] }
 0x304   : > { %p21_p10 = scmp.ge.s32.totalorder %s24_s29, 6   ;;  %s4386_s24 = smov %s2740_s25 }
 0x305   : > { %s4387_s25 = smov %s2744_s26  ;;  %s4388_s26 = smov %s2900_s19 }
 0x306   : > { %s4389_s27 = smov %s2752_s28  ;;  %23 = sbr.rel (!%p21_p10) target bundleno = 10 (0xa), region = 125 }
 0x309   : > { %s4390_s28 = smov %s4385_s14 }
 0x30b   :  { %2184 = vsyncpa [#allocation4], 1 }
 0x30c   :  { %2186 = vsyncpa [#allocation4 + $0x1], 1 }
 0x30d   :  { %2187 = vsyncpa [#allocation7], 1 }
 0x30e   :  { %2188 = vsyncpa [#allocation5], 1 }
 0x30f   :  { %2190 = vsyncpa [#allocation5 + $0x1], 1 }

</bundles_post_ra>
